<compile_context>
chip_gen: v6e
topology: v6e:2x2x1
jax: 0.10.0
libtpu: 0.0.40
codegen_flags: <defaults>
</compile_context>

<pallas_src>
import functools

import jax
import jax.numpy as jnp
from jax.experimental import pallas as pl
from jax.experimental.pallas import tpu as pltpu


def _round_up(x, m):
    return ((x + m - 1) // m) * m


def _news_encoder_kernel(idx_ref, conv_m_ref, conv_b_ref,
                         att_w_ref, att_b_ref, att_q_ref,
                         mlp_w_ref, mlp_b_ref, out_ref,
                         *, window_size, title_len):
    W = window_size
    T = title_len
    BtT = idx_ref.shape[1]
    Bt = BtT // T
    Vp = conv_m_ref.shape[1]
    F_out = conv_m_ref.shape[2]

    # --- Conv2d(1, F, (W, E)) with the embedding table pre-folded into each tap. ---
    # For tap w the shifted/zero-padded gather is expressed as a one-hot (exact 0/1
    # selection) matmul against the folded (Vp, F) weight; out-of-title positions use
    # a sentinel index pointing at an all-zero row.  No roll / pad / concat relayouts.
    lane_v = jax.lax.broadcasted_iota(jnp.int32, (BtT, Vp), 1)
    conv = jnp.zeros((BtT, F_out), jnp.float32)
    for w in range(W):                                     # static, unrolled taps
        onehot = (idx_ref[w] == lane_v).astype(jnp.bfloat16)        # (BtT, Vp)
        conv = conv + jnp.dot(onehot, conv_m_ref[w],
                              preferred_element_type=jnp.float32)   # (BtT, F) f32
    act = jnp.maximum(conv + conv_b_ref[...], 0.0)                   # ReLU, f32
    # TODO(synk): training-mode dropout would use pltpu.prng_seed / prng_random_bits.

    # --- Additive attention: VPU multiply + lane reduce, softmax over T (lanes). ---
    proj = jnp.tanh(
        jnp.dot(act.astype(jnp.bfloat16), att_w_ref[...],
                preferred_element_type=jnp.float32) + att_b_ref[...])        # (BtT, Q)
    scores = jnp.sum((proj * att_q_ref[...]).reshape(Bt, T, -1), axis=-1)    # (Bt, T)
    scores = scores - jnp.max(scores, axis=-1, keepdims=True)
    expw = jnp.exp(scores)
    alpha = expw * pl.reciprocal(jnp.sum(expw, axis=-1, keepdims=True))      # exact
    weighted = jnp.sum(alpha[:, :, None] * act.reshape(Bt, T, F_out),
                       axis=1)                                               # (Bt, F)

    # --- MLP head: Linear(F, 3F) + ReLU (Dropout = identity at inference). ---
    out = jnp.dot(weighted.astype(jnp.bfloat16), mlp_w_ref[...],
                  preferred_element_type=jnp.float32) + mlp_b_ref[...]
    out_ref[...] = jnp.maximum(out, 0.0)                             # (Bt, OUT_PAD)


def init_params(key, *, num_words, embed_dim, num_filters, window_size,
                query_dim):
    ks = jax.random.split(key, 7)
    scale = 0.1
    embedding = scale * jax.random.normal(ks[0], (num_words, embed_dim),
                                          jnp.float32)
    embedding = embedding.at[0].set(0.0)                    # padding_idx = 0
    conv_w = scale * jax.random.normal(
        ks[1], (num_filters, 1, window_size, embed_dim), jnp.float32)
    conv_b = scale * jax.random.normal(ks[2], (num_filters,), jnp.float32)
    att_w = scale * jax.random.normal(ks[3], (query_dim, num_filters),
                                      jnp.float32)
    att_b = scale * jax.random.normal(ks[4], (query_dim,), jnp.float32)
    att_q = jax.random.uniform(ks[5], (query_dim,), jnp.float32, -0.1, 0.1)
    mlp_w = scale * jax.random.normal(ks[6], (3 * num_filters, num_filters),
                                      jnp.float32)
    mlp_b = jnp.zeros((3 * num_filters,), jnp.float32)
    return dict(embedding=embedding, conv_w=conv_w, conv_b=conv_b,
                att_w=att_w, att_b=att_b, att_q=att_q,
                mlp_w=mlp_w, mlp_b=mlp_b)


def news_encoder_forward(title_idx, category_idx, subcategory_idx, params,
                         *, window_size, block_batch=None):
    del category_idx, subcategory_idx        # unused by the reference forward
    assert window_size >= 1 and window_size % 2 == 1, \
        "PyTorch Conv2d padding (W-1)//2 preserves T only for odd window_size"

    title_idx = title_idx.astype(jnp.int32)
    B, T = title_idx.shape
    table = params["embedding"].astype(jnp.float32)          # (V, E)
    V, _E = table.shape
    F_out = params["conv_b"].shape[0]
    Q = params["att_b"].shape[0]
    W = window_size
    OUT = 3 * F_out
    OUT_PAD = _round_up(OUT, 128)                            # lane-dense output
    Vp = _round_up(V + 1, 128)                               # +1 zero "sentinel" row
    SENT = V                                                 # sentinel -> zero row

    # ---- Weight folding & layout plumbing (tiny XLA work, once per call). ----
    # Fold the embedding table into each conv tap: M[w] = table @ conv_w[:, w, :]^T.
    # Exact refactoring of gather->conv at inference (embedding dropout = identity).
    # TODO(synk): for very large vocabularies (folded (V,F) > VMEM) replace the
    # one-hot matmul gather with a scalar-prefetch (SMEM title_idx) + manual DMA
    # row gather from the table in HBM.
    conv_wt = params["conv_w"][:, 0].astype(jnp.float32)      # (F, W, E)
    conv_m = jnp.einsum("ve,fwe->wvf", table, conv_wt)        # (W, V, F) f32
    conv_m = jnp.pad(conv_m, ((0, 0), (0, Vp - V), (0, 0))).astype(jnp.bfloat16)
    conv_b = params["conv_b"].reshape(1, F_out).astype(jnp.float32)
    att_w = params["att_w"].T.astype(jnp.bfloat16)            # (F, Q)
    att_b = params["att_b"].reshape(1, Q).astype(jnp.float32)
    att_q = params["att_q"].reshape(1, Q).astype(jnp.float32)
    mlp_w = jnp.pad(params["mlp_w"].T,
                    ((0, 0), (0, OUT_PAD - OUT))).astype(jnp.bfloat16)   # (F, OUT_PAD)
    mlp_b = jnp.pad(params["mlp_b"],
                    ((0, OUT_PAD - OUT),)).reshape(1, OUT_PAD).astype(jnp.float32)

    # ---- Per-tap shifted title indices (the conv "pad + shift" done on int32). ----
    pad = (W - 1) // 2
    pos = jnp.arange(T)
    taps = []
    for w in range(W):
        src = pos + (w - pad)
        valid = (src >= 0) & (src < T)
        tap = jnp.where(valid[None, :],
                        title_idx[:, jnp.clip(src, 0, T - 1)], SENT)
        taps.append(tap)
    idx_taps = jnp.stack(taps, axis=0)                        # (W, B, T) int32

    # ---- Batch tile selection: VMEM-capacity aware (v7x has only 64 MiB). ----
    weight_bytes = (2 * W * Vp * F_out + 4 * F_out + 2 * F_out * Q + 8 * Q
                    + 2 * F_out * OUT_PAD + 4 * OUT_PAD)
    try:
        vmem_phys = int(pltpu.get_tpu_info().vmem_capacity_bytes)
    except Exception:
        vmem_phys = 64 * 2**20                                # v7x-safe fallback
    per_row = (2 * 4 * W * T                                  # idx tile, double-buffered
               + 12 * T * Vp                                  # one-hot chain (iota/bool/bf16)
               + 4 * T * (2 * F_out + Q + 8)                  # conv acc / act / proj / misc
               + 2 * 4 * OUT_PAD)                             # double-buffered output
    budget = max(8 * 2**20, int(0.35 * vmem_phys) - weight_bytes)
    auto_tile = max(8, min(4096, (budget // per_row) // 8 * 8))
    B8 = _round_up(B, 8)
    if block_batch is None:
        B_tile = min(B8, auto_tile)
    else:
        B_tile = min(B8, max(8, _round_up(block_batch, 8)))
    # v7x has two TensorCores: keep >=2 grid steps so ("parallel",) can split batch.
    if B8 // B_tile < 2 and B8 >= 16:
        B_tile = max(8, ((B8 // 2) // 8) * 8)
    B_pad = _round_up(B, B_tile)
    grid = (B_pad // B_tile,)

    idx_taps = jnp.pad(idx_taps, ((0, 0), (0, B_pad - B), (0, 0)),
                       constant_values=SENT)
    idx_taps = idx_taps.reshape(W, B_pad * T, 1)

    step_bytes = B_tile * per_row
    vmem_limit = int(min(0.7 * vmem_phys,
                         max(32 * 2**20, 4 * (weight_bytes + step_bytes))))

    flops = (2 * B_pad * T * W * Vp * F_out        # folded gather+conv matmuls
             + 2 * B_pad * T * F_out * Q           # attention projection
             + 2 * B_pad * F_out * OUT_PAD)        # MLP head
    transcendentals = B_pad * T * Q + B_pad * T + B_pad
    bytes_accessed = 4 * W * B_pad * T + weight_bytes + 4 * B_pad * OUT_PAD

    kernel = functools.partial(_news_encoder_kernel, window_size=W, title_len=T)

    def _resident(arr):                                       # VMEM-resident weights
        n = arr.ndim
        return pl.BlockSpec(arr.shape, lambda i, n=n: (0,) * n)

    in_specs = [
        pl.BlockSpec((W, B_tile * T, 1), lambda i: (0, i, 0)),   # pipelined idx tile
        _resident(conv_m), _resident(conv_b),
        _resident(att_w), _resident(att_b), _resident(att_q),
        _resident(mlp_w), _resident(mlp_b),
    ]
    out_specs = pl.BlockSpec((B_tile, OUT_PAD), lambda i: (i, 0))

    out = pl.pallas_call(
        kernel,
        grid=grid,
        out_shape=jax.ShapeDtypeStruct((B_pad, OUT_PAD), jnp.float32),
        in_specs=in_specs,
        out_specs=out_specs,
        compiler_params=pltpu.CompilerParams(
            dimension_semantics=("parallel",),
            vmem_limit_bytes=vmem_limit),
        cost_estimate=pl.CostEstimate(flops=flops,
                                      transcendentals=transcendentals,
                                      bytes_accessed=bytes_accessed),
    )(idx_taps, conv_m, conv_b, att_w, att_b, att_q, mlp_w, mlp_b)
    return out[:B, :OUT]


def reference_forward(title_idx, params, *, window_size):
    """Pure-JAX f32 mirror of the PyTorch module (eval mode)."""
    emb = jnp.take(params["embedding"], title_idx, axis=0)
    B, T, _ = emb.shape
    pad = (window_size - 1) // 2
    emb_pad = jnp.pad(emb, ((0, 0), (pad, pad), (0, 0)))
    conv_w = params["conv_w"][:, 0]                          # (F, W, E)
    conv = jnp.zeros((B, T, conv_w.shape[0]), jnp.float32)
    for w in range(window_size):
        conv = conv + jnp.einsum("bte,fe->btf", emb_pad[:, w:w + T, :],
                                 conv_w[:, w, :])
    act = jnp.maximum(conv + params["conv_b"], 0.0)          # (B, T, F)
    proj = jnp.tanh(jnp.einsum("btf,qf->btq", act, params["att_w"])
                    + params["att_b"])
    scores = jnp.einsum("btq,q->bt", proj, params["att_q"])
    alpha = jax.nn.softmax(scores, axis=1)
    weighted = jnp.einsum("bt,btf->bf", alpha, act)
    out = weighted @ params["mlp_w"].T + params["mlp_b"]
    return jnp.maximum(out, 0.0)


if __name__ == "__main__":
    # Small config consistent with the module's forward (config.use_batch=True).
    B = 10                  # batch_size (not tile-aligned -> exercises batch padding)
    T = 16                  # num_words_title
    NUM_WORDS = 50          # vocab size
    EMBED_DIM = 32          # word_embedding_dim
    NUM_FILTERS = 16        # num_filters
    WINDOW = 3              # window_size (odd, >= 1)
    QUERY_DIM = 32          # query_vector_dim

    key = jax.random.PRNGKey(0)
    k_param, k_title, k_cat, k_sub = jax.random.split(key, 4)
    params = init_params(k_param, num_words=NUM_WORDS, embed_dim=EMBED_DIM,
                         num_filters=NUM_FILTERS, window_size=WINDOW,
                         query_dim=QUERY_DIM)

    title_idx = jax.random.randint(k_title, (B, T), 0, NUM_WORDS, jnp.int32)
    category_idx = jax.random.randint(k_cat, (B,), 0, 10, jnp.int32)
    subcategory_idx = jax.random.randint(k_sub, (B,), 0, 10, jnp.int32)

    # Auto tile -> B padded to 16, tile 8, grid of 2 steps (exercises the pipeline).
    out = news_encoder_forward(title_idx, category_idx, subcategory_idx,
                               params, window_size=WINDOW)
    out = jax.block_until_ready(out)

    ref = reference_forward(title_idx, params, window_size=WINDOW)
    assert out.shape == (B, 3 * NUM_FILTERS), out.shape
    max_err = float(jnp.max(jnp.abs(out - ref)))
    # Tolerance accommodates the bf16 matmul-operand weights (f32 accumulation).
    assert jnp.allclose(out, ref, atol=1e-2, rtol=1e-2), f"max abs err = {max_err}"
    print("KERNEL_OK")
</pallas_src>

<mosaic_0001>
module attributes {stable_mosaic.version = 11 : i64} {
  func.func @_news_encoder_kernel(%arg0: i32, %arg1: memref<3x128x1xi32, #tpu.memory_space<vmem>>, %arg2: memref<3x128x16xbf16, #tpu.memory_space<vmem>>, %arg3: memref<1x16xf32, #tpu.memory_space<vmem>>, %arg4: memref<16x32xbf16, #tpu.memory_space<vmem>>, %arg5: memref<1x32xf32, #tpu.memory_space<vmem>>, %arg6: memref<1x32xf32, #tpu.memory_space<vmem>>, %arg7: memref<16x128xbf16, #tpu.memory_space<vmem>>, %arg8: memref<1x128xf32, #tpu.memory_space<vmem>>, %arg9: memref<8x128xf32, #tpu.memory_space<vmem>>) attributes {dimension_semantics = [#tpu.dimension_semantics<parallel>], iteration_bounds = array<i64: 2>, scalar_prefetch = 0 : i64, scratch_operands = 0 : i64, tpu.core_type = #tpu.core_type<tc>, window_params = [{transform_indices = @transform_0, window_bounds = array<i64: 3, 128, 1>}, {pipeline_mode = #tpu.pipeline_mode<synchronous>, transform_indices = @transform_1, window_bounds = array<i64: 3, 128, 16>}, {pipeline_mode = #tpu.pipeline_mode<synchronous>, transform_indices = @transform_2, window_bounds = array<i64: 1, 16>}, {pipeline_mode = #tpu.pipeline_mode<synchronous>, transform_indices = @transform_3, window_bounds = array<i64: 16, 32>}, {pipeline_mode = #tpu.pipeline_mode<synchronous>, transform_indices = @transform_4, window_bounds = array<i64: 1, 32>}, {pipeline_mode = #tpu.pipeline_mode<synchronous>, transform_indices = @transform_5, window_bounds = array<i64: 1, 32>}, {pipeline_mode = #tpu.pipeline_mode<synchronous>, transform_indices = @transform_6, window_bounds = array<i64: 16, 128>}, {pipeline_mode = #tpu.pipeline_mode<synchronous>, transform_indices = @transform_7, window_bounds = array<i64: 1, 128>}, {transform_indices = @transform_8, window_bounds = array<i64: 8, 128>}]} {
    %0 = tpu.iota {dimensions = array<i32: 1>} : vector<128x128xi32>
    %cst = arith.constant 0.000000e+00 : f32
    %1 = vector.broadcast %cst : f32 to vector<128x16xf32>
    %c0 = arith.constant 0 : index
    %c0_0 = arith.constant 0 : index
    %c0_1 = arith.constant 0 : index
    %2 = vector.load %arg1[%c0, %c0_0, %c0_1] : memref<3x128x1xi32, #tpu.memory_space<vmem>>, vector<1x128x1xi32>
    %3 = vector.shape_cast %2 : vector<1x128x1xi32> to vector<128x1xi32>
    %4 = vector.broadcast %3 : vector<128x1xi32> to vector<128x128xi32>
    %5 = arith.cmpi eq, %4, %0 : vector<128x128xi32>
    %6 = arith.extui %5 : vector<128x128xi1> to vector<128x128xi32>
    %7 = arith.sitofp %6 : vector<128x128xi32> to vector<128x128xf32>
    %8 = arith.truncf %7 : vector<128x128xf32> to vector<128x128xbf16>
    %c0_2 = arith.constant 0 : index
    %c0_3 = arith.constant 0 : index
    %c0_4 = arith.constant 0 : index
    %9 = vector.load %arg2[%c0_2, %c0_3, %c0_4] : memref<3x128x16xbf16, #tpu.memory_space<vmem>>, vector<1x128x16xbf16>
    %10 = vector.shape_cast %9 : vector<1x128x16xbf16> to vector<128x16xbf16>
    %cst_5 = arith.constant dense<0.000000e+00> : vector<128x16xf32>
    %11 = tpu.matmul %8, %10, %cst_5 {dimension_numbers = #tpu.dot_dimension_numbers<[1], [0], [0], [1], [0, 0, 1, 1], [], []>} : vector<128x128xbf16>, vector<128x16xbf16>, vector<128x16xf32> -> vector<128x16xf32>
    %12 = arith.addf %1, %11 : vector<128x16xf32>
    %c1 = arith.constant 1 : index
    %c0_6 = arith.constant 0 : index
    %c0_7 = arith.constant 0 : index
    %13 = vector.load %arg1[%c1, %c0_6, %c0_7] : memref<3x128x1xi32, #tpu.memory_space<vmem>>, vector<1x128x1xi32>
    %14 = vector.shape_cast %13 : vector<1x128x1xi32> to vector<128x1xi32>
    %15 = vector.broadcast %14 : vector<128x1xi32> to vector<128x128xi32>
    %16 = arith.cmpi eq, %15, %0 : vector<128x128xi32>
    %17 = arith.extui %16 : vector<128x128xi1> to vector<128x128xi32>
    %18 = arith.sitofp %17 : vector<128x128xi32> to vector<128x128xf32>
    %19 = arith.truncf %18 : vector<128x128xf32> to vector<128x128xbf16>
    %c1_8 = arith.constant 1 : index
    %c0_9 = arith.constant 0 : index
    %c0_10 = arith.constant 0 : index
    %20 = vector.load %arg2[%c1_8, %c0_9, %c0_10] : memref<3x128x16xbf16, #tpu.memory_space<vmem>>, vector<1x128x16xbf16>
    %21 = vector.shape_cast %20 : vector<1x128x16xbf16> to vector<128x16xbf16>
    %cst_11 = arith.constant dense<0.000000e+00> : vector<128x16xf32>
    %22 = tpu.matmul %19, %21, %cst_11 {dimension_numbers = #tpu.dot_dimension_numbers<[1], [0], [0], [1], [0, 0, 1, 1], [], []>} : vector<128x128xbf16>, vector<128x16xbf16>, vector<128x16xf32> -> vector<128x16xf32>
    %23 = arith.addf %12, %22 : vector<128x16xf32>
    %c2 = arith.constant 2 : index
    %c0_12 = arith.constant 0 : index
    %c0_13 = arith.constant 0 : index
    %24 = vector.load %arg1[%c2, %c0_12, %c0_13] : memref<3x128x1xi32, #tpu.memory_space<vmem>>, vector<1x128x1xi32>
    %25 = vector.shape_cast %24 : vector<1x128x1xi32> to vector<128x1xi32>
    %26 = vector.broadcast %25 : vector<128x1xi32> to vector<128x128xi32>
    %27 = arith.cmpi eq, %26, %0 : vector<128x128xi32>
    %28 = arith.extui %27 : vector<128x128xi1> to vector<128x128xi32>
    %29 = arith.sitofp %28 : vector<128x128xi32> to vector<128x128xf32>
    %30 = arith.truncf %29 : vector<128x128xf32> to vector<128x128xbf16>
    %c2_14 = arith.constant 2 : index
    %c0_15 = arith.constant 0 : index
    %c0_16 = arith.constant 0 : index
    %31 = vector.load %arg2[%c2_14, %c0_15, %c0_16] : memref<3x128x16xbf16, #tpu.memory_space<vmem>>, vector<1x128x16xbf16>
    %32 = vector.shape_cast %31 : vector<1x128x16xbf16> to vector<128x16xbf16>
    %cst_17 = arith.constant dense<0.000000e+00> : vector<128x16xf32>
    %33 = tpu.matmul %30, %32, %cst_17 {dimension_numbers = #tpu.dot_dimension_numbers<[1], [0], [0], [1], [0, 0, 1, 1], [], []>} : vector<128x128xbf16>, vector<128x16xbf16>, vector<128x16xf32> -> vector<128x16xf32>
    %34 = arith.addf %23, %33 : vector<128x16xf32>
    %c0_18 = arith.constant 0 : index
    %c0_19 = arith.constant 0 : index
    %35 = vector.load %arg3[%c0_18, %c0_19] : memref<1x16xf32, #tpu.memory_space<vmem>>, vector<1x16xf32>
    %36 = vector.broadcast %35 : vector<1x16xf32> to vector<128x16xf32>
    %37 = arith.addf %34, %36 : vector<128x16xf32>
    %cst_20 = arith.constant 0.000000e+00 : f32
    %38 = vector.broadcast %cst_20 : f32 to vector<128x16xf32>
    %39 = arith.maximumf %37, %38 : vector<128x16xf32>
    %40 = arith.truncf %39 : vector<128x16xf32> to vector<128x16xbf16>
    %c0_21 = arith.constant 0 : index
    %c0_22 = arith.constant 0 : index
    %41 = vector.load %arg4[%c0_21, %c0_22] : memref<16x32xbf16, #tpu.memory_space<vmem>>, vector<16x32xbf16>
    %cst_23 = arith.constant dense<0.000000e+00> : vector<128x32xf32>
    %42 = tpu.matmul %40, %41, %cst_23 {dimension_numbers = #tpu.dot_dimension_numbers<[1], [0], [0], [1], [0, 0, 1, 1], [], []>} : vector<128x16xbf16>, vector<16x32xbf16>, vector<128x32xf32> -> vector<128x32xf32>
    %c0_24 = arith.constant 0 : index
    %c0_25 = arith.constant 0 : index
    %43 = vector.load %arg5[%c0_24, %c0_25] : memref<1x32xf32, #tpu.memory_space<vmem>>, vector<1x32xf32>
    %44 = vector.broadcast %43 : vector<1x32xf32> to vector<128x32xf32>
    %45 = arith.addf %42, %44 : vector<128x32xf32>
    %46 = math.tanh %45 : vector<128x32xf32>
    %c0_26 = arith.constant 0 : index
    %c0_27 = arith.constant 0 : index
    %47 = vector.load %arg6[%c0_26, %c0_27] : memref<1x32xf32, #tpu.memory_space<vmem>>, vector<1x32xf32>
    %48 = vector.broadcast %47 : vector<1x32xf32> to vector<128x32xf32>
    %49 = arith.mulf %46, %48 : vector<128x32xf32>
    %50 = vector.shape_cast %49 : vector<128x32xf32> to vector<8x16x32xf32>
    %cst_28 = arith.constant dense<0.000000e+00> : vector<8x16xf32>
    %51 = vector.multi_reduction <add>, %50, %cst_28 [2] : vector<8x16x32xf32> to vector<8x16xf32>
    %cst_29 = arith.constant dense<0xFF800000> : vector<8xf32>
    %52 = vector.multi_reduction <maximumf>, %51, %cst_29 [1] : vector<8x16xf32> to vector<8xf32>
    %53 = vector.shape_cast %52 : vector<8xf32> to vector<8x1xf32>
    %54 = vector.broadcast %53 : vector<8x1xf32> to vector<8x16xf32>
    %55 = arith.subf %51, %54 : vector<8x16xf32>
    %56 = math.exp %55 : vector<8x16xf32>
    %cst_30 = arith.constant dense<0.000000e+00> : vector<8xf32>
    %57 = vector.multi_reduction <add>, %56, %cst_30 [1] : vector<8x16xf32> to vector<8xf32>
    %58 = vector.shape_cast %57 : vector<8xf32> to vector<8x1xf32>
    %59 = tpu.reciprocal %58 : vector<8x1xf32> -> vector<8x1xf32>
    %60 = vector.broadcast %59 : vector<8x1xf32> to vector<8x16xf32>
    %61 = arith.mulf %56, %60 : vector<8x16xf32>
    %62 = vector.shape_cast %61 : vector<8x16xf32> to vector<8x16x1xf32>
    %63 = vector.shape_cast %39 : vector<128x16xf32> to vector<8x16x16xf32>
    %64 = vector.broadcast %62 : vector<8x16x1xf32> to vector<8x16x16xf32>
    %65 = arith.mulf %64, %63 : vector<8x16x16xf32>
    %cst_31 = arith.constant dense<0.000000e+00> : vector<8x16xf32>
    %66 = vector.multi_reduction <add>, %65, %cst_31 [1] : vector<8x16x16xf32> to vector<8x16xf32>
    %67 = arith.truncf %66 : vector<8x16xf32> to vector<8x16xbf16>
    %c0_32 = arith.constant 0 : index
    %c0_33 = arith.constant 0 : index
    %68 = vector.load %arg7[%c0_32, %c0_33] : memref<16x128xbf16, #tpu.memory_space<vmem>>, vector<16x128xbf16>
    %cst_34 = arith.constant dense<0.000000e+00> : vector<8x128xf32>
    %69 = tpu.matmul %67, %68, %cst_34 {dimension_numbers = #tpu.dot_dimension_numbers<[1], [0], [0], [1], [0, 0, 1, 1], [], []>} : vector<8x16xbf16>, vector<16x128xbf16>, vector<8x128xf32> -> vector<8x128xf32>
    %c0_35 = arith.constant 0 : index
    %c0_36 = arith.constant 0 : index
    %70 = vector.load %arg8[%c0_35, %c0_36] : memref<1x128xf32, #tpu.memory_space<vmem>>, vector<1x128xf32>
    %71 = vector.broadcast %70 : vector<1x128xf32> to vector<8x128xf32>
    %72 = arith.addf %69, %71 : vector<8x128xf32>
    %cst_37 = arith.constant 0.000000e+00 : f32
    %73 = vector.broadcast %cst_37 : f32 to vector<8x128xf32>
    %74 = arith.maximumf %72, %73 : vector<8x128xf32>
    %c0_38 = arith.constant 0 : index
    %c0_39 = arith.constant 0 : index
    %75 = vector.load %arg9[%c0_38, %c0_39] : memref<8x128xf32, #tpu.memory_space<vmem>>, vector<8x128xf32>
    tpu.vector_store %arg9[%c0_38, %c0_39], %74 {strides = array<i32>} : memref<8x128xf32, #tpu.memory_space<vmem>>, vector<8x128xf32>,
    return
  }
  func.func @transform_0(%arg0: i32) -> (i32, i32, i32) {
    %c0_i32 = arith.constant 0 : i32
    %c0_i32_0 = arith.constant 0 : i32
    %c0_i32_1 = arith.constant 0 : i32
    return %c0_i32, %arg0, %c0_i32_0 : i32, i32, i32
  }
  func.func @transform_1(%arg0: i32) -> (i32, i32, i32) {
    %c0_i32 = arith.constant 0 : i32
    %c0_i32_0 = arith.constant 0 : i32
    %c0_i32_1 = arith.constant 0 : i32
    %c0_i32_2 = arith.constant 0 : i32
    return %c0_i32, %c0_i32_0, %c0_i32_1 : i32, i32, i32
  }
  func.func @transform_2(%arg0: i32) -> (i32, i32) {
    %c0_i32 = arith.constant 0 : i32
    %c0_i32_0 = arith.constant 0 : i32
    %c0_i32_1 = arith.constant 0 : i32
    return %c0_i32, %c0_i32_0 : i32, i32
  }
  func.func @transform_3(%arg0: i32) -> (i32, i32) {
    %c0_i32 = arith.constant 0 : i32
    %c0_i32_0 = arith.constant 0 : i32
    %c0_i32_1 = arith.constant 0 : i32
    return %c0_i32, %c0_i32_0 : i32, i32
  }
  func.func @transform_4(%arg0: i32) -> (i32, i32) {
    %c0_i32 = arith.constant 0 : i32
    %c0_i32_0 = arith.constant 0 : i32
    %c0_i32_1 = arith.constant 0 : i32
    return %c0_i32, %c0_i32_0 : i32, i32
  }
  func.func @transform_5(%arg0: i32) -> (i32, i32) {
    %c0_i32 = arith.constant 0 : i32
    %c0_i32_0 = arith.constant 0 : i32
    %c0_i32_1 = arith.constant 0 : i32
    return %c0_i32, %c0_i32_0 : i32, i32
  }
  func.func @transform_6(%arg0: i32) -> (i32, i32) {
    %c0_i32 = arith.constant 0 : i32
    %c0_i32_0 = arith.constant 0 : i32
    %c0_i32_1 = arith.constant 0 : i32
    return %c0_i32, %c0_i32_0 : i32, i32
  }
  func.func @transform_7(%arg0: i32) -> (i32, i32) {
    %c0_i32 = arith.constant 0 : i32
    %c0_i32_0 = arith.constant 0 : i32
    %c0_i32_1 = arith.constant 0 : i32
    return %c0_i32, %c0_i32_0 : i32, i32
  }
  func.func @transform_8(%arg0: i32) -> (i32, i32) {
    %c0_i32 = arith.constant 0 : i32
    %c0_i32_0 = arith.constant 0 : i32
    return %arg0, %c0_i32 : i32, i32
  }
}

</mosaic_0001>

<bundles_post_ra>
// kernel: tpu_custom_call.1
= control target key start
LH: loop header
LB: loop body
LE: loop exit
PB: predicated region body
PF: predicated region fallthrough
CT: control target
= control target key end

     0   :  { %13 = vsyncpa [#allocation4], 0  ;;  %s3954_s0 = inlined_call_operand.vmem [shape: s32[3,256,1], index: 0, kind: input, shape index: {}]   ;;  %s3955_s1 = inlined_call_operand.vmem [shape: bf16[3,128,16], index: 1, kind: input, shape index: {}]   ;;  %s3956_s2 = inlined_call_operand.vmem [shape: f32[1,16], index: 2, kind: input, shape index: {}]   ;;  %s3957_s3 = inlined_call_operand.vmem [shape: bf16[16,32], index: 3, kind: input, shape index: {}]   ;;  %s3958_s4 = inlined_call_operand.vmem [shape: f32[1,32], index: 4, kind: input, shape index: {}]   ;;  %s3959_s5 = inlined_call_operand.vmem [shape: f32[1,32], index: 5, kind: input, shape index: {}]   ;;  %s3960_s6 = inlined_call_operand.vmem [shape: bf16[16,128], index: 6, kind: input, shape index: {}]   ;;  %s3961_s7 = inlined_call_operand.vmem [shape: f32[1,128], index: 7, kind: input, shape index: {}]   ;;  %s3962_s8 = inlined_call_operand.hbm [shape: f32[16,128], index: 8, kind: output, shape index: {}]  }
   0x1   :  { %15 = vsyncpa [#allocation4 + $0x1], 0  ;;  %s3049_s27 = smov 0   ;;  %s3051_s28 = smov 0  }
   0x2   :  { %s3053_s29 = smov 0   ;;  %s3055_s30 = smov 0  }
   0x3 LB: > { %s2407_s9 = sadd.s32 4294967295, %s2997_s30   ;;  %s2408_s10 = sadd.s32 4294967294, %s2997_s30   ;;  %s2997_s30 = sphi %s3055_s30, %s4004_s30   ;;  %s2993_s29 = sphi %s3053_s29, %s4003_s29   ;;  %s2989_s28 = sphi %s3051_s28, %s4002_s28   ;;  %s2985_s27 = sphi %s3049_s27, %s4001_s27  }
   0x4   : > { %s3072_s11 = sadd.s32 1, %s2997_s30   ;;  %s28_s12 = sadd.s32 1, %s2993_s29 }
   0x5   : > { %s25_s13 = ssub.s32 %s2997_s30, %s3072_s11  ;;  %p35_p0 = scmp.ne.s32.totalorder %s2993_s29, %s2989_s28 }
   0x6   : > { %p26_p1 = scmp.eq.s32.totalorder %s25_s13, 0  ;;  %p36_p2 = scmp.eq.s32.totalorder %s2997_s30, 0 }
   0x7   : > { %p212_p3 = scmp.eq.s32.totalorder %s2407_s9, 1  ;;  %p217_p4 = scmp.ne.s32.totalorder %s2989_s28, %s2985_s27 }
   0x8   : > { %s3085_s14 = scalar_select %p26_p1, %s2993_s29, %s28_s12  }
   0x9   : > { %p37_p5 = por %p36_p2, %p35_p0  ;;  %p3087_p6 = por %p212_p3, %p35_p0 }
   0xa   : > { %p218_p7 = scmp.eq.s32.totalorder %s2408_s10, 1  ;;  %p2410_p9 = scmp.ge.s32.totalorder %s2997_s30, 2 }
   0xc   : > { %p3091_p8 = por %p218_p7, %p217_p4  ;;  %255 = sbr.rel (%p2410_p9) target bundleno = 46 (0x2e), region = 44 }
  0x11   : > { %258 = sbr.rel (!%p37_p5) target bundleno = 46 (0x2e), region = 48  ;;  %s260_s17 = sand.u32 (%p37_p5), 1, %s2993_s29  }
  0x12   : > { %s2618_s18 = sshll.u32 (%p37_p5), %s2997_s30, 7  ;;  %s2798_s19 = smul.u32 (%p37_p5), 384, %s260_s17 }
  0x13   : > { %s3103_s22 = scalar_lea.vmem (%p37_p5), %s3954_s0, %s2618_s18 }
  0x14   : > { %v388_v0 = vld [vmem:[%s3103_s22] sm:$0xff] (%p37_p5)  ;;  %v390_v1 = vld [vmem:[%s3103_s22 + $0x8] sm:$0xff] (%p37_p5)  ;;  %v392_v2 = vld [vmem:[%s3103_s22 + $0x10] sm:$0xff] (%p37_p5)  ;;  %s3111_s23 = scalar_lea.vmem (%p37_p5), [#allocation2], %s2798_s19 }
  0x15   : > { %v394_v3 = vld [vmem:[%s3103_s22 + $0x18] sm:$0xff] (%p37_p5)  ;;  %v396_v4 = vld [vmem:[%s3103_s22 + $0x20] sm:$0xff] (%p37_p5)  ;;  %v398_v5 = vld [vmem:[%s3103_s22 + $0x28] sm:$0xff] (%p37_p5)  ;;  %389 = vst [vmem:[%s3111_s23] sm:$0xff] (%p37_p5), %v388_v0 }
  0x16   : > { %391 = vst [vmem:[%s3111_s23 + $0x8] sm:$0xff] %v390_v1  ;;  %393 = vst [vmem:[%s3111_s23 + $0x10] sm:$0xff] %v392_v2  ;;  %v400_v6 = vld [vmem:[%s3103_s22 + $0x30] sm:$0xff]  ;;  %v402_v7 = vld [vmem:[%s3103_s22 + $0x38] sm:$0xff] }
  0x17   : > { %395 = vst [vmem:[%s3111_s23 + $0x18] sm:$0xff] %v394_v3  ;;  %397 = vst [vmem:[%s3111_s23 + $0x20] sm:$0xff] %v396_v4  ;;  %v404_v8 = vld [vmem:[%s3103_s22 + $0x40] sm:$0xff]  ;;  %v406_v9 = vld [vmem:[%s3103_s22 + $0x48] sm:$0xff] }
  0x18   : > { %399 = vst [vmem:[%s3111_s23 + $0x28] sm:$0xff] %v398_v5  ;;  %401 = vst [vmem:[%s3111_s23 + $0x30] sm:$0xff] %v400_v6  ;;  %v408_v10 = vld [vmem:[%s3103_s22 + $0x50] sm:$0xff]  ;;  %v410_v11 = vld [vmem:[%s3103_s22 + $0x58] sm:$0xff] }
  0x19   : > { %403 = vst [vmem:[%s3111_s23 + $0x38] sm:$0xff] %v402_v7  ;;  %405 = vst [vmem:[%s3111_s23 + $0x40] sm:$0xff] %v404_v8  ;;  %v412_v12 = vld [vmem:[%s3103_s22 + $0x60] sm:$0xff]  ;;  %v414_v13 = vld [vmem:[%s3103_s22 + $0x68] sm:$0xff] }
  0x1a   : > { %407 = vst [vmem:[%s3111_s23 + $0x48] sm:$0xff] %v406_v9  ;;  %409 = vst [vmem:[%s3111_s23 + $0x50] sm:$0xff] %v408_v10  ;;  %v416_v14 = vld [vmem:[%s3103_s22 + $0x70] sm:$0xff]  ;;  %v418_v15 = vld [vmem:[%s3103_s22 + $0x78] sm:$0xff] }
  0x1b   : > { %411 = vst [vmem:[%s3111_s23 + $0x58] sm:$0xff] %v410_v11  ;;  %413 = vst [vmem:[%s3111_s23 + $0x60] sm:$0xff] %v412_v12  ;;  %v420_v16 = vld [vmem:[%s3103_s22 + $0x100] sm:$0xff]  ;;  %v422_v17 = vld [vmem:[%s3103_s22 + $0x108] sm:$0xff] }
  0x1c   : > { %415 = vst [vmem:[%s3111_s23 + $0x68] sm:$0xff] %v414_v13  ;;  %417 = vst [vmem:[%s3111_s23 + $0x70] sm:$0xff] %v416_v14  ;;  %v424_v18 = vld [vmem:[%s3103_s22 + $0x110] sm:$0xff]  ;;  %v426_v19 = vld [vmem:[%s3103_s22 + $0x118] sm:$0xff] }
  0x1d   : > { %419 = vst [vmem:[%s3111_s23 + $0x78] sm:$0xff] %v418_v15  ;;  %421 = vst [vmem:[%s3111_s23 + $0x80] sm:$0xff] %v420_v16  ;;  %v428_v20 = vld [vmem:[%s3103_s22 + $0x120] sm:$0xff]  ;;  %v430_v21 = vld [vmem:[%s3103_s22 + $0x128] sm:$0xff] }
  0x1e   : > { %423 = vst [vmem:[%s3111_s23 + $0x88] sm:$0xff] %v422_v17  ;;  %425 = vst [vmem:[%s3111_s23 + $0x90] sm:$0xff] %v424_v18  ;;  %v432_v22 = vld [vmem:[%s3103_s22 + $0x130] sm:$0xff]  ;;  %v434_v23 = vld [vmem:[%s3103_s22 + $0x138] sm:$0xff] }
  0x1f   : > { %427 = vst [vmem:[%s3111_s23 + $0x98] sm:$0xff] %v426_v19  ;;  %429 = vst [vmem:[%s3111_s23 + $0xa0] sm:$0xff] %v428_v20  ;;  %v436_v24 = vld [vmem:[%s3103_s22 + $0x140] sm:$0xff]  ;;  %v438_v25 = vld [vmem:[%s3103_s22 + $0x148] sm:$0xff] }
  0x20   : > { %431 = vst [vmem:[%s3111_s23 + $0xa8] sm:$0xff] %v430_v21  ;;  %433 = vst [vmem:[%s3111_s23 + $0xb0] sm:$0xff] %v432_v22  ;;  %v440_v26 = vld [vmem:[%s3103_s22 + $0x150] sm:$0xff]  ;;  %v442_v27 = vld [vmem:[%s3103_s22 + $0x158] sm:$0xff] }
  0x21   : > { %435 = vst [vmem:[%s3111_s23 + $0xb8] sm:$0xff] %v434_v23  ;;  %437 = vst [vmem:[%s3111_s23 + $0xc0] sm:$0xff] %v436_v24  ;;  %v444_v28 = vld [vmem:[%s3103_s22 + $0x160] sm:$0xff]  ;;  %v446_v29 = vld [vmem:[%s3103_s22 + $0x168] sm:$0xff] }
  0x22   : > { %439 = vst [vmem:[%s3111_s23 + $0xc8] sm:$0xff] %v438_v25  ;;  %441 = vst [vmem:[%s3111_s23 + $0xd0] sm:$0xff] %v440_v26  ;;  %v448_v30 = vld [vmem:[%s3103_s22 + $0x170] sm:$0xff]  ;;  %v450_v31 = vld [vmem:[%s3103_s22 + $0x178] sm:$0xff] }
  0x23   : > { %443 = vst [vmem:[%s3111_s23 + $0xd8] sm:$0xff] %v442_v27  ;;  %445 = vst [vmem:[%s3111_s23 + $0xe0] sm:$0xff] %v444_v28  ;;  %v452_v32 = vld [vmem:[%s3103_s22 + $0x200] sm:$0xff]  ;;  %v454_v33 = vld [vmem:[%s3103_s22 + $0x208] sm:$0xff] }
  0x24   : > { %447 = vst [vmem:[%s3111_s23 + $0xe8] sm:$0xff] %v446_v29  ;;  %449 = vst [vmem:[%s3111_s23 + $0xf0] sm:$0xff] %v448_v30  ;;  %v456_v34 = vld [vmem:[%s3103_s22 + $0x210] sm:$0xff]  ;;  %v458_v35 = vld [vmem:[%s3103_s22 + $0x218] sm:$0xff] }
  0x25   : > { %451 = vst [vmem:[%s3111_s23 + $0xf8] sm:$0xff] %v450_v31  ;;  %453 = vst [vmem:[%s3111_s23 + $0x100] sm:$0xff] %v452_v32  ;;  %v460_v36 = vld [vmem:[%s3103_s22 + $0x220] sm:$0xff]  ;;  %v462_v37 = vld [vmem:[%s3103_s22 + $0x228] sm:$0xff] }
  0x26   : > { %455 = vst [vmem:[%s3111_s23 + $0x108] sm:$0xff] %v454_v33  ;;  %457 = vst [vmem:[%s3111_s23 + $0x110] sm:$0xff] %v456_v34  ;;  %v464_v38 = vld [vmem:[%s3103_s22 + $0x230] sm:$0xff]  ;;  %v466_v39 = vld [vmem:[%s3103_s22 + $0x238] sm:$0xff] }
  0x27   : > { %459 = vst [vmem:[%s3111_s23 + $0x118] sm:$0xff] %v458_v35  ;;  %461 = vst [vmem:[%s3111_s23 + $0x120] sm:$0xff] %v460_v36  ;;  %v468_v40 = vld [vmem:[%s3103_s22 + $0x240] sm:$0xff]  ;;  %v470_v41 = vld [vmem:[%s3103_s22 + $0x248] sm:$0xff] }
  0x28   : > { %463 = vst [vmem:[%s3111_s23 + $0x128] sm:$0xff] %v462_v37  ;;  %465 = vst [vmem:[%s3111_s23 + $0x130] sm:$0xff] %v464_v38  ;;  %v472_v42 = vld [vmem:[%s3103_s22 + $0x250] sm:$0xff]  ;;  %v474_v43 = vld [vmem:[%s3103_s22 + $0x258] sm:$0xff] }
  0x29   : > { %467 = vst [vmem:[%s3111_s23 + $0x138] sm:$0xff] %v466_v39  ;;  %469 = vst [vmem:[%s3111_s23 + $0x140] sm:$0xff] %v468_v40  ;;  %v476_v44 = vld [vmem:[%s3103_s22 + $0x260] sm:$0xff]  ;;  %v478_v45 = vld [vmem:[%s3103_s22 + $0x268] sm:$0xff] }
  0x2a   : > { %471 = vst [vmem:[%s3111_s23 + $0x148] sm:$0xff] %v470_v41  ;;  %473 = vst [vmem:[%s3111_s23 + $0x150] sm:$0xff] %v472_v42  ;;  %v480_v46 = vld [vmem:[%s3103_s22 + $0x270] sm:$0xff]  ;;  %v482_v47 = vld [vmem:[%s3103_s22 + $0x278] sm:$0xff] }
  0x2b   : > { %475 = vst [vmem:[%s3111_s23 + $0x158] sm:$0xff] %v474_v43  ;;  %477 = vst [vmem:[%s3111_s23 + $0x160] sm:$0xff] %v476_v44 }
  0x2c   : > { %479 = vst [vmem:[%s3111_s23 + $0x168] sm:$0xff] %v478_v45  ;;  %481 = vst [vmem:[%s3111_s23 + $0x170] sm:$0xff] %v480_v46 }
  0x2d   : > { %483 = vst [vmem:[%s3111_s23 + $0x178] sm:$0xff] %v482_v47 }
  0x2e PF: > { %p2413_p10 = scmp.ge.s32.totalorder %s2997_s30, 1  ;;  %p488_p11 = scmp.lt.s32.totalorder %s2997_s30, 3 }
  0x30   : > { %p489_p12 = pnand %p2413_p10, %p488_p11 }
  0x31   : > { %s3206_s24 = sand.u32 (!%p489_p12), 1, %s2989_s28   ;;  %s2615_s13 = sshll.u32 (!%p489_p12), %s2407_s9, 7 }
  0x32   : > { %492 = sbr.rel (%p489_p12) target bundleno = 1732 (0x6c4), region = 86  ;;  %s3911_s22 = scalar_lea.hbm (!%p489_p12), %s3962_s8, %s2615_s13 }
  0x33   : > { %s2799_s25 = smul.u32 (!%p489_p12), 384, %s3206_s24  ;;  %s2330_s23 = scalar_lea.sflag (!%p489_p12), [#allocation4], %s3206_s24 }
  0x35   : > { %s3215_s17 = scalar_lea.vmem (!%p489_p12), [#allocation2], %s2799_s25  ;;  %s3003_s25 = smov (!%p489_p12), [#allocation3]  }
  0x36   : > { %s2941_s26 = sshll.u32 (!%p489_p12), %s3003_s25, 4  ;;  %s2942_s26 = int_to_ptr.vmem [resolvable:$false] %s2941_s26 }
  0x37   : > { %v2999_v48 = vmov 0   ;;  %v2845_v49 = vld [vmem:[%s3955_s1 + $0x78] sm:$0xff]   ;;  %v2846_v50 = vld [vmem:[%s3955_s1 + $0x70] sm:$0xff]   ;;  %v2431_v52 = vld [vmem:[%s3215_s17 + $0x80] sm:$0xff] }
  0x38   : > { %2844 = vset.pattern.permute.xlu1 %v2999_v48  ;;  %2843 = vset.pattern.permute.xlu0 %v2999_v48  ;;  %v2433_v51 = vld [vmem:[%s3215_s17 + $0x90] sm:$0xff]  ;;  %v2434_v53 = vld [vmem:[%s3215_s17 + $0x98] sm:$0xff]  ;;  %v2432_v54 = vld [vmem:[%s3215_s17 + $0x88] sm:$0xff] }
  0x39   : > { %2678 = vmatprep.subr.bf16.mxu0 %v2845_v49  ;;  %692 = vperm.xlu1 %2844, %v2433_v51   ;;  %v2847_v55 = vld [vmem:[%s3955_s1 + $0x68] sm:$0xff]   ;;  %v2435_v57 = vld [vmem:[%s3215_s17 + $0xa0] sm:$0xff]  ;;  %v2438_v58 = vld [vmem:[%s3215_s17 + $0xb8] sm:$0xff] }
  0x3a   : > { %2679 = vmatpush3.bf16.msra.mxu0 %v2845_v49  ;;  %686 = vperm.xlu0 %2843, %v2431_v52   ;;  %v2436_v56 = vld [vmem:[%s3215_s17 + $0xa8] sm:$0xff]  ;;  %v2437_v59 = vld [vmem:[%s3215_s17 + $0xb0] sm:$0xff]  ;;  %v2439_v61 = vld [vmem:[%s3215_s17 + $0xc0] sm:$0xff] }
  0x3b   : > { %2680 = vmatprep.subr.bf16.mxu0 %v2846_v50  ;;  %v2440_v60 = vld [vmem:[%s3215_s17 + $0xc8] sm:$0xff]  ;;  %v2442_v62 = vld [vmem:[%s3215_s17 + $0xd8] sm:$0xff]  ;;  %v2848_v63 = vld [vmem:[%s3955_s1 + $0x60] sm:$0xff]  }
  0x3c   : > { %v2849_v0 = vld [vmem:[%s3955_s1 + $0x58] sm:$0xff]   ;;  %v2441_v1 = vld [vmem:[%s3215_s17 + $0xd0] sm:$0xff]  ;;  %v2444_v2 = vld [vmem:[%s3215_s17 + $0xe8] sm:$0xff] }
  0x3d   : > { %695 = vperm.xlu1 %2844, %v2434_v53   ;;  %v2443_v3 = vld [vmem:[%s3215_s17 + $0xe0] sm:$0xff]  ;;  %v2850_v4 = vld [vmem:[%s3955_s1 + $0x50] sm:$0xff]   ;;  %v2853_v5 = vld [vmem:[%s3955_s1 + $0x38] sm:$0xff]  }
  0x3e   : > { %2681 = vmatpush3.bf16.msra.mxu0 %v2846_v50  ;;  %689 = vperm.xlu0 %2843, %v2432_v54   ;;  %v2854_v6 = vld [vmem:[%s3955_s1 + $0x30] sm:$0xff]   ;;  %v2446_v7 = vld [vmem:[%s3215_s17 + $0xf8] sm:$0xff]  ;;  %v2851_v8 = vld [vmem:[%s3955_s1 + $0x48] sm:$0xff]   ;;  %v530_v50 = vlaneseq }
  0x3f   : > { %2682 = vmatprep.subr.bf16.mxu0 %v2847_v55  ;;  %2710 = vmatprep.subr.bf16.mxu1 %v2853_v5  ;;  %v2445_v9 = vld [vmem:[%s3215_s17 + $0xf0] sm:$0xff]  ;;  %v2855_v10 = vld [vmem:[%s3955_s1 + $0x28] sm:$0xff]   ;;  %v2852_v12 = vld [vmem:[%s3955_s1 + $0x40] sm:$0xff]  }
  0x40   : > { %2711 = vmatpush3.bf16.msra.mxu1 %v2853_v5  ;;  %v533_v11 = vld [vmem:[%s3215_s17 + $0x8] sm:$0xff]  ;;  %v532_v13 = vld [vmem:[%s3215_s17] sm:$0xff]  ;;  %v535_v15 = vld [vmem:[%s3215_s17 + $0x18] sm:$0xff]  ;;  %v3314_v53 = vand.u32 127, %v530_v50 }
  0x41   : > { %701 = vperm.xlu1 %2844, %v2436_v56   ;;  %2712 = vmatprep.subr.bf16.mxu1 %v2854_v6  ;;  %v2857_v14 = vld [vmem:[%s3955_s1 + $0x20] sm:$0xff]   ;;  %v3269_v16 = vld [vmem:[%s3955_s1 + $0xb8] sm:$0xff]   ;;  %v534_v17 = vld [vmem:[%s3215_s17 + $0x10] sm:$0xff] }
  0x42   : > { %2683 = vmatpush3.bf16.msra.mxu0 %v2847_v55  ;;  %698 = vperm.xlu0 %2843, %v2435_v57   ;;  %v2859_v18 = vld [vmem:[%s3955_s1 + $0x18] sm:$0xff]   ;;  %v2528_v19 = vld [vmem:[%s3215_s17 + $0x108] sm:$0xff]  ;;  %v2527_v20 = vld [vmem:[%s3215_s17 + $0x100] sm:$0xff]  ;;  %v3000_v57 = vmov 1.0|1.0  }
  0x43   : > { %2684 = vmatprep.subr.bf16.mxu0 %v2848_v63  ;;  %v2861_v21 = vld [vmem:[%s3955_s1 + $0x10] sm:$0xff]   ;;  %v2530_v22 = vld [vmem:[%s3215_s17 + $0x118] sm:$0xff]  ;;  %v2863_v24 = vld [vmem:[%s3955_s1 + $0x8] sm:$0xff]  }
  0x44   : > { %2713 = vmatpush3.bf16.msra.mxu1 %v2854_v6  ;;  %v2529_v23 = vld [vmem:[%s3215_s17 + $0x110] sm:$0xff]  ;;  %v537_v25 = vld [vmem:[%s3215_s17 + $0x28] sm:$0xff]  ;;  %v536_v26 = vld [vmem:[%s3215_s17 + $0x20] sm:$0xff] }
  0x45   : > { %707 = vperm.xlu1 %2844, %v2438_v58   ;;  %2714 = vmatprep.subr.bf16.mxu1 %v2855_v10  ;;  %v2865_v27 = vld [vmem:[%s3955_s1] sm:$0xff]   ;;  %v539_v28 = vld [vmem:[%s3215_s17 + $0x38] sm:$0xff]  ;;  %v538_v29 = vld [vmem:[%s3215_s17 + $0x30] sm:$0xff] }
  0x46   : > { %704 = vperm.xlu0 %2843, %v2437_v59   ;;  %2685 = vmatpush3.bf16.msra.mxu0 %v2848_v63  ;;  %v2532_v30 = vld [vmem:[%s3215_s17 + $0x128] sm:$0xff]  ;;  %v2531_v31 = vld [vmem:[%s3215_s17 + $0x120] sm:$0xff]  ;;  %v2534_v32 = vld [vmem:[%s3215_s17 + $0x138] sm:$0xff] }
  0x47   : > { %2686 = vmatprep.subr.bf16.mxu0 %v2849_v0  ;;  %v2533_v33 = vld [vmem:[%s3215_s17 + $0x130] sm:$0xff]  ;;  %v541_v34 = vld [vmem:[%s3215_s17 + $0x48] sm:$0xff]  ;;  %v540_v35 = vld [vmem:[%s3215_s17 + $0x40] sm:$0xff] }
  0x48   : > { %2715 = vmatpush3.bf16.msra.mxu1 %v2855_v10  ;;  %v543_v36 = vld [vmem:[%s3215_s17 + $0x58] sm:$0xff]  ;;  %v542_v37 = vld [vmem:[%s3215_s17 + $0x50] sm:$0xff]  ;;  %v2536_v38 = vld [vmem:[%s3215_s17 + $0x148] sm:$0xff] }
  0x49   : > { %713 = vperm.xlu1 %2844, %v2440_v60   ;;  %2716 = vmatprep.subr.bf16.mxu1 %v2857_v14  ;;  %v2535_v39 = vld [vmem:[%s3215_s17 + $0x140] sm:$0xff]  ;;  %v2538_v40 = vld [vmem:[%s3215_s17 + $0x158] sm:$0xff]  ;;  %v2537_v41 = vld [vmem:[%s3215_s17 + $0x150] sm:$0xff] }
  0x4a   : > { %710 = vperm.xlu0 %2843, %v2439_v61   ;;  %2687 = vmatpush3.bf16.msra.mxu0 %v2849_v0  ;;  %v545_v42 = vld [vmem:[%s3215_s17 + $0x68] sm:$0xff]  ;;  %v544_v43 = vld [vmem:[%s3215_s17 + $0x60] sm:$0xff]  ;;  %v547_v44 = vld [vmem:[%s3215_s17 + $0x78] sm:$0xff] }
  0x4b   : > { %2688 = vmatprep.subr.bf16.mxu0 %v2850_v4  ;;  %v546_v45 = vld [vmem:[%s3215_s17 + $0x70] sm:$0xff]  ;;  %v2540_v46 = vld [vmem:[%s3215_s17 + $0x168] sm:$0xff]  ;;  %v2539_v47 = vld [vmem:[%s3215_s17 + $0x160] sm:$0xff] }
  0x4c   : > { %2717 = vmatpush3.bf16.msra.mxu1 %v2857_v14  ;;  %v2542_v48 = vld [vmem:[%s3215_s17 + $0x178] sm:$0xff]  ;;  %v2541_v49 = vld [vmem:[%s3215_s17 + $0x170] sm:$0xff]  ;;  %v2860_v60 = vld [vmem:[%s3955_s1 + $0xa8] sm:$0xff]   ;;  %s2414_s17 = sshll.u32 %s3206_s24, 3 }
  0x4d   : > { %719 = vperm.xlu1 %2844, %v2442_v62   ;;  %2718 = vmatprep.subr.bf16.mxu1 %v2859_v18  ;;  %v2858_v56 = vld [vmem:[%s3955_s1 + $0xb0] sm:$0xff]   ;;  %v2862_v63 = vld [vmem:[%s3955_s1 + $0xa0] sm:$0xff]   ;;  %s527_s18 = scalar_lea.vmem [#allocation3], %s2414_s17  ;;  %s2943_s17 = scalar_lea.vmem %s2942_s26, 256 }
  0x4e   : > { %716 = vperm.xlu0 %2843, %v2441_v1   ;;  %2689 = vmatpush3.bf16.msra.mxu0 %v2850_v4  ;;  %v2866_v5 = vld [vmem:[%s3955_s1 + $0x90] sm:$0xff]   ;;  %s2343_s19 = sshll.u32 %s527_s18, 4  ;;  %s3913_s19 = int_to_ptr.vmem [resolvable:$true] %s2343_s19 }
  0x4f   : > { %2690 = vmatprep.subr.bf16.mxu0 %v2851_v8  ;;  %s2937_s9 = scalar_lea.vmem %s3913_s19, 128  ;;  %p2944_p2 = scmp.lt.s32.totalorder %s3913_s19, %s2942_s26 }
  0x50   : > { %2719 = vmatpush3.bf16.msra.mxu1 %v2859_v18  ;;  %p2938_p13 = scmp.ne.s32.totalorder %s3913_s19, %s2937_s9  ;;  %p2945_p3 = scmp.lt.s32.totalorder %s2943_s17, %s2937_s9 }
  0x51   : > { %725 = vperm.xlu1 %2844, %v2444_v2   ;;  %2720 = vmatprep.subr.bf16.mxu1 %v2861_v21  ;;  %v2864_v2 = vld [vmem:[%s3955_s1 + $0x98] sm:$0xff]  }
  0x52   : > { %722 = vperm.xlu0 %2843, %v2443_v3   ;;  %2691 = vmatpush3.bf16.msra.mxu0 %v2851_v8  ;;  %v2867_v8 = vld [vmem:[%s3955_s1 + $0x88] sm:$0xff]   ;;  %p2939_p0 = pnand %p2938_p13, %p3087_p6  ;;  %p2946_p4 = por %p2945_p3, %p2944_p2 }
  0x53   : > { %2692 = vmatprep.subr.bf16.mxu0 %v2852_v12 }
  0x54   : > { %2721 = vmatpush3.bf16.msra.mxu1 %v2861_v21  ;;  %p2940_p1 = pneg %p2939_p0 }
  0x55   : > { %731 = vperm.xlu1 %2844, %v2446_v7   ;;  %2722 = vmatprep.subr.bf16.mxu1 %v2863_v24 }
  0x56   : > { %728 = vperm.xlu0 %2843, %v2445_v9   ;;  %2693 = vmatpush3.bf16.msra.mxu0 %v2852_v12  ;;  %p2947_p5 = pnand %p2946_p4, %p2940_p1 }
  0x57   : > { %2742 = vmatprep.subr.bf16.mxu0 %v3269_v16 }
  0x58   : > { %2723 = vmatpush3.bf16.msra.mxu1 %v2863_v24 }
  0x59   : > { %552 = vperm.xlu1 %2844, %v533_v11   ;;  %2724 = vmatprep.subr.bf16.mxu1 %v2865_v27  ;;  %v2868_v11 = vld [vmem:[%s3955_s1 + $0x80] sm:$0xff]  }
  0x5a   : > { %549 = vperm.xlu0 %2843, %v532_v13  }
  0x5c   : > { %2725 = vmatpush3.bf16.msra.mxu1 %v2865_v27 }
  0x5d   : > { %558 = vperm.xlu1 %2844, %v535_v15  }
  0x5e   : > { %555 = vperm.xlu0 %2843, %v534_v17  }
  0x61   : > { %1117 = vperm.xlu1 %2844, %v2528_v19  }
  0x62   : > { %1114 = vperm.xlu0 %2843, %v2527_v20  }
  0x65   : > { %1123 = vperm.xlu1 %2844, %v2530_v22  }
  0x66   : > { %1120 = vperm.xlu0 %2843, %v2529_v23  }
  0x69   : > { %564 = vperm.xlu1 %2844, %v537_v25  }
  0x6a   : > { %561 = vperm.xlu0 %2843, %v536_v26  }
  0x6d   : > { %570 = vperm.xlu1 %2844, %v539_v28  }
  0x6e   : > { %567 = vperm.xlu0 %2843, %v538_v29  }
  0x71   : > { %1129 = vperm.xlu1 %2844, %v2532_v30  }
  0x72   : > { %1126 = vperm.xlu0 %2843, %v2531_v31  }
  0x75   : > { %1135 = vperm.xlu1 %2844, %v2534_v32  }
  0x76   : > { %1132 = vperm.xlu0 %2843, %v2533_v33  }
  0x79   : > { %576 = vperm.xlu1 %2844, %v541_v34  }
  0x7a   : > { %573 = vperm.xlu0 %2843, %v540_v35  }
  0x7d   : > { %582 = vperm.xlu1 %2844, %v543_v36  }
  0x7e   : > { %579 = vperm.xlu0 %2843, %v542_v37  }
  0x81   : > { %1141 = vperm.xlu1 %2844, %v2536_v38  }
  0x82   : > { %1138 = vperm.xlu0 %2843, %v2535_v39  }
  0x85   : > { %1147 = vperm.xlu1 %2844, %v2538_v40  }
  0x86   : > { %1144 = vperm.xlu0 %2843, %v2537_v41  }
  0x89   : > { %588 = vperm.xlu1 %2844, %v545_v42  }
  0x8a   : > { %585 = vperm.xlu0 %2843, %v544_v43  }
  0x8d   : > { %594 = vperm.xlu1 %2844, %v547_v44   ;;  %v2869_v44 = vld [vmem:[%s3957_s3] sm:$0xff]  }
  0x8e   : > { %591 = vperm.xlu0 %2843, %v546_v45   ;;  %2774 = vmatprep.subr.bf16.mxu1 %v2869_v44 }
  0x91   : > { %1153 = vperm.xlu1 %2844, %v2540_v46  }
  0x92   : > { %1150 = vperm.xlu0 %2843, %v2539_v47  }
  0x95   : > { %1159 = vperm.xlu1 %2844, %v2542_v48  }
  0x96   : > { %1156 = vperm.xlu0 %2843, %v2541_v49  }
  0xb4   : > { %v693_v51 = vpop.permute.xlu1 %692 }
  0xb5   : > { %v687_v52 = vpop.permute.xlu0 %686  ;;  %vm735_vm0 = vcmp.eq.s32.totalorder %v693_v51, %v3314_v53 }
  0xb6   : > { %vm733_vm4 = vcmp.eq.s32.totalorder %v687_v52, %v3314_v53 }
  0xb8   : > { %v696_v54 = vpop.permute.xlu1 %695 }
  0xb9   : > { %v690_v55 = vpop.permute.xlu0 %689  ;;  %vm736_vm1 = vcmp.eq.s32.totalorder %v696_v54, %v3314_v53 }
  0xba   : > { %vm734_vm2 = vcmp.eq.s32.totalorder %v690_v55, %v3314_v53  ;;  %vm2489_vm3 = vmpackc.low %vm736_vm1, %vm735_vm0 }
  0xbb   : > { %vm2487_vm5 = vmpackc.low %vm734_vm2, %vm733_vm4 }
  0xbc   : > { %2694 = vmatprep.mubr.msk.bf16.mxu0 %vm2487_vm5, %v3000_v57  ;;  %v702_v58 = vpop.permute.xlu1 %701 }
  0xbd   : > { %v699_v59 = vpop.permute.xlu0 %698  ;;  %vm738_vm6 = vcmp.eq.s32.totalorder %v702_v58, %v3314_v53  ;;  %2695 = vmatmul.mubr.msk.bf16.vlgmr.msra.gmra.mxu0 %vm2489_vm3, %v3000_v57 }
  0xbe   : > { %vm737_vm7 = vcmp.eq.s32.totalorder %v699_v59, %v3314_v53  ;;  %2743 = vmatpush3.bf16.msra.mxu0 %v3269_v16 }
  0xbf   : > { %vm2491_vm8 = vmpackc.low %vm738_vm6, %vm737_vm7  ;;  %2744 = vmatprep.subr.bf16.mxu0 %v2858_v56 }
  0xc0   : > { %2698 = vmatprep.mubr.msk.bf16.mxu0 %vm2491_vm8, %v3000_v57  ;;  %v708_v61 = vpop.permute.xlu1 %707 }
  0xc1   : > { %v705_v62 = vpop.permute.xlu0 %704  ;;  %vm740_vm9 = vcmp.eq.s32.totalorder %v708_v61, %v3314_v53 }
  0xc2   : > { %vm739_vm10 = vcmp.eq.s32.totalorder %v705_v62, %v3314_v53  ;;  %2745 = vmatpush3.bf16.msra.mxu0 %v2858_v56 }
  0xc3   : > { %vm2493_vm11 = vmpackc.low %vm740_vm9, %vm739_vm10  ;;  %2746 = vmatprep.subr.bf16.mxu0 %v2860_v60 }
  0xc4   : > { %v714_v0 = vpop.permute.xlu1 %713 }
  0xc5   : > { %v711_v1 = vpop.permute.xlu0 %710  ;;  %vm742_vm12 = vcmp.eq.s32.totalorder %v714_v0, %v3314_v53  ;;  %2699 = vmatmul.mubr.msk.bf16.gmra.mxu0 %vm2493_vm11, %v3000_v57 }
  0xc6   : > { %vm741_vm13 = vcmp.eq.s32.totalorder %v711_v1, %v3314_v53  ;;  %2747 = vmatpush3.bf16.msra.mxu0 %v2860_v60 }
  0xc7   : > { %vm2495_vm14 = vmpackc.low %vm742_vm12, %vm741_vm13  ;;  %2748 = vmatprep.subr.bf16.mxu0 %v2862_v63 }
  0xc8   : > { %2702 = vmatprep.mubr.msk.bf16.mxu0 %vm2495_vm14, %v3000_v57  ;;  %v720_v3 = vpop.permute.xlu1 %719 }
  0xc9   : > { %v717_v4 = vpop.permute.xlu0 %716  ;;  %vm744_vm15 = vcmp.eq.s32.totalorder %v720_v3, %v3314_v53 }
  0xca   : > { %vm743_vm0 = vcmp.eq.s32.totalorder %v717_v4, %v3314_v53  ;;  %2749 = vmatpush3.bf16.msra.mxu0 %v2862_v63 }
  0xcb   : > { %vm2497_vm1 = vmpackc.low %vm744_vm15, %vm743_vm0  ;;  %2750 = vmatprep.subr.bf16.mxu0 %v2864_v2 }
  0xcc   : > { %v726_v6 = vpop.permute.xlu1 %725 }
  0xcd   : > { %v723_v7 = vpop.permute.xlu0 %722  ;;  %vm746_vm2 = vcmp.eq.s32.totalorder %v726_v6, %v3314_v53  ;;  %2703 = vmatmul.mubr.msk.bf16.gmra.mxu0 %vm2497_vm1, %v3000_v57 }
  0xce   : > { %vm745_vm3 = vcmp.eq.s32.totalorder %v723_v7, %v3314_v53  ;;  %2751 = vmatpush3.bf16.msra.mxu0 %v2864_v2 }
  0xcf   : > { %vm2499_vm4 = vmpackc.low %vm746_vm2, %vm745_vm3  ;;  %2752 = vmatprep.subr.bf16.mxu0 %v2866_v5 }
  0xd0   : > { %2706 = vmatprep.mubr.msk.bf16.mxu0 %vm2499_vm4, %v3000_v57  ;;  %v732_v9 = vpop.permute.xlu1 %731 }
  0xd1   : > { %v729_v10 = vpop.permute.xlu0 %728  ;;  %vm748_vm5 = vcmp.eq.s32.totalorder %v732_v9, %v3314_v53 }
  0xd2   : > { %vm747_vm6 = vcmp.eq.s32.totalorder %v729_v10, %v3314_v53  ;;  %2753 = vmatpush3.bf16.msra.mxu0 %v2866_v5 }
  0xd3   : > { %vm2501_vm7 = vmpackc.low %vm748_vm5, %vm747_vm6  ;;  %2754 = vmatprep.subr.bf16.mxu0 %v2867_v8 }
  0xd4   : > { %v553_v12 = vpop.permute.xlu1 %552 }
  0xd5   : > { %v550_v13 = vpop.permute.xlu0 %549  ;;  %2707 = vmatmul.mubr.msk.bf16.gmra.mxu0 %vm2501_vm7, %v3000_v57  ;;  %vm597_vm8 = vcmp.eq.s32.totalorder %v553_v12, %v3314_v53  ;;  %v3432_v12 = vld [vmem:[%s3956_s2] ss:$0 sm:$0xff] }
  0xd6   : > { %vm596_vm9 = vcmp.eq.s32.totalorder %v550_v13, %v3314_v53  ;;  %2755 = vmatpush3.bf16.msra.mxu0 %v2867_v8 }
  0xd7   : > { %vm2511_vm10 = vmpackc.low %vm597_vm8, %vm596_vm9  ;;  %2756 = vmatprep.subr.bf16.mxu0 %v2868_v11 }
  0xd8   : > { %2726 = vmatprep.mubr.msk.bf16.mxu1 %vm2511_vm10, %v3000_v57  ;;  %v559_v14 = vpop.permute.xlu1 %558 }
  0xd9   : > { %v556_v15 = vpop.permute.xlu0 %555  ;;  %vm599_vm11 = vcmp.eq.s32.totalorder %v559_v14, %v3314_v53 }
  0xda   : > { %vm598_vm12 = vcmp.eq.s32.totalorder %v556_v15, %v3314_v53  ;;  %2757 = vmatpush3.bf16.msra.mxu0 %v2868_v11 }
  0xdb   : > { %vm2513_vm13 = vmpackc.low %vm599_vm11, %vm598_vm12 }
  0xdc   : > { %2727 = vmatmul.mubr.msk.bf16.vlgmr.msra.gmra.mxu1 %vm2513_vm13, %v3000_v57  ;;  %v1118_v16 = vpop.permute.xlu1 %1117 }
  0xdd   : > { %v1115_v17 = vpop.permute.xlu0 %1114  ;;  %vm1162_vm14 = vcmp.eq.s32.totalorder %v1118_v16, %v3314_v53  ;;  %2775 = vmatpush3.bf16.msra.mxu1 %v2869_v44 }
  0xde   : > { %vm1161_vm15 = vcmp.eq.s32.totalorder %v1115_v17, %v3314_v53 }
  0xdf   : > { %vm2583_vm0 = vmpackc.low %vm1162_vm14, %vm1161_vm15 }
  0xe0   : > { %2758 = vmatprep.mubr.msk.bf16.mxu0 %vm2583_vm0, %v3000_v57  ;;  %v1124_v18 = vpop.permute.xlu1 %1123 }
  0xe1   : > { %v1121_v19 = vpop.permute.xlu0 %1120  ;;  %vm1164_vm1 = vcmp.eq.s32.totalorder %v1124_v18, %v3314_v53 }
  0xe2   : > { %vm1163_vm2 = vcmp.eq.s32.totalorder %v1121_v19, %v3314_v53 }
  0xe3   : > { %vm2585_vm3 = vmpackc.low %vm1164_vm1, %vm1163_vm2 }
  0xe4   : > { %2759 = vmatmul.mubr.msk.bf16.vlgmr.msra.gmra.mxu0 %vm2585_vm3, %v3000_v57  ;;  %v565_v20 = vpop.permute.xlu1 %564 }
  0xe5   : > { %v562_v21 = vpop.permute.xlu0 %561  ;;  %vm601_vm4 = vcmp.eq.s32.totalorder %v565_v20, %v3314_v53 }
  0xe6   : > { %vm600_vm5 = vcmp.eq.s32.totalorder %v562_v21, %v3314_v53 }
  0xe7   : > { %vm2515_vm6 = vmpackc.low %vm601_vm4, %vm600_vm5 }
  0xe8   : > { %2730 = vmatprep.mubr.msk.bf16.mxu1 %vm2515_vm6, %v3000_v57  ;;  %v571_v22 = vpop.permute.xlu1 %570 }
  0xe9   : > { %v568_v23 = vpop.permute.xlu0 %567  ;;  %vm603_vm7 = vcmp.eq.s32.totalorder %v571_v22, %v3314_v53 }
  0xea   : > { %vm602_vm8 = vcmp.eq.s32.totalorder %v568_v23, %v3314_v53 }
  0xeb   : > { %vm2517_vm9 = vmpackc.low %vm603_vm7, %vm602_vm8 }
  0xec   : > { %2731 = vmatmul.mubr.msk.bf16.gmra.mxu1 %vm2517_vm9, %v3000_v57  ;;  %v1130_v24 = vpop.permute.xlu1 %1129 }
  0xed   : > { %v1127_v25 = vpop.permute.xlu0 %1126  ;;  %vm1166_vm10 = vcmp.eq.s32.totalorder %v1130_v24, %v3314_v53 }
  0xee   : > { %vm1165_vm11 = vcmp.eq.s32.totalorder %v1127_v25, %v3314_v53 }
  0xef   : > { %vm2587_vm12 = vmpackc.low %vm1166_vm10, %vm1165_vm11 }
  0xf0   : > { %2762 = vmatprep.mubr.msk.bf16.mxu0 %vm2587_vm12, %v3000_v57  ;;  %v1136_v26 = vpop.permute.xlu1 %1135 }
  0xf1   : > { %v1133_v27 = vpop.permute.xlu0 %1132  ;;  %vm1168_vm13 = vcmp.eq.s32.totalorder %v1136_v26, %v3314_v53 }
  0xf2   : > { %vm1167_vm14 = vcmp.eq.s32.totalorder %v1133_v27, %v3314_v53 }
  0xf3   : > { %vm2589_vm15 = vmpackc.low %vm1168_vm13, %vm1167_vm14 }
  0xf4   : > { %2763 = vmatmul.mubr.msk.bf16.gmra.mxu0 %vm2589_vm15, %v3000_v57  ;;  %v577_v28 = vpop.permute.xlu1 %576 }
  0xf5   : > { %v574_v29 = vpop.permute.xlu0 %573  ;;  %vm605_vm0 = vcmp.eq.s32.totalorder %v577_v28, %v3314_v53 }
  0xf6   : > { %vm604_vm1 = vcmp.eq.s32.totalorder %v574_v29, %v3314_v53 }
  0xf7   : > { %vm2519_vm2 = vmpackc.low %vm605_vm0, %vm604_vm1 }
  0xf8   : > { %2734 = vmatprep.mubr.msk.bf16.mxu1 %vm2519_vm2, %v3000_v57  ;;  %v583_v30 = vpop.permute.xlu1 %582 }
  0xf9   : > { %v580_v31 = vpop.permute.xlu0 %579  ;;  %vm607_vm3 = vcmp.eq.s32.totalorder %v583_v30, %v3314_v53 }
  0xfa   : > { %vm606_vm4 = vcmp.eq.s32.totalorder %v580_v31, %v3314_v53 }
  0xfb   : > { %vm2521_vm5 = vmpackc.low %vm607_vm3, %vm606_vm4 }
  0xfc   : > { %2735 = vmatmul.mubr.msk.bf16.gmra.mxu1 %vm2521_vm5, %v3000_v57  ;;  %v1142_v32 = vpop.permute.xlu1 %1141 }
  0xfd   : > { %v1139_v33 = vpop.permute.xlu0 %1138  ;;  %vm1170_vm6 = vcmp.eq.s32.totalorder %v1142_v32, %v3314_v53 }
  0xfe   : > { %vm1169_vm7 = vcmp.eq.s32.totalorder %v1139_v33, %v3314_v53 }
  0xff   : > { %vm2591_vm8 = vmpackc.low %vm1170_vm6, %vm1169_vm7 }
 0x100   : > { %2766 = vmatprep.mubr.msk.bf16.mxu0 %vm2591_vm8, %v3000_v57  ;;  %v1148_v34 = vpop.permute.xlu1 %1147  ;;  %vm1457_vm8 = vcmask 130048  }
 0x101   : > { %v1145_v35 = vpop.permute.xlu0 %1144  ;;  %vm1172_vm9 = vcmp.eq.s32.totalorder %v1148_v34, %v3314_v53 }
 0x102   : > { %vm1171_vm10 = vcmp.eq.s32.totalorder %v1145_v35, %v3314_v53 }
 0x103   : > { %vm2593_vm11 = vmpackc.low %vm1172_vm9, %vm1171_vm10  ;;  %vm1618_vm9 = vcmask 261120   ;;  %vm1692_vm10 = vcmask 130112  }
 0x104   : > { %2767 = vmatmul.mubr.msk.bf16.gmra.mxu0 %vm2593_vm11, %v3000_v57  ;;  %v589_v36 = vpop.permute.xlu1 %588  ;;  %vm1757_vm11 = vcmask 1041409  }
 0x105   : > { %v586_v37 = vpop.permute.xlu0 %585  ;;  %vm609_vm12 = vcmp.eq.s32.totalorder %v589_v36, %v3314_v53 }
 0x106   : > { %vm608_vm13 = vcmp.eq.s32.totalorder %v586_v37, %v3314_v53 }
 0x107   : > { %vm2523_vm14 = vmpackc.low %vm609_vm12, %vm608_vm13  ;;  %vm1759_vm12 = vcmask 1042434   ;;  %vm1761_vm13 = vcmask 1043459  }
 0x108   : > { %2738 = vmatprep.mubr.msk.bf16.mxu1 %vm2523_vm14, %v3000_v57  ;;  %v595_v38 = vpop.permute.xlu1 %594  ;;  %vm1763_vm14 = vcmask 1044484  }
 0x109   : > { %v592_v39 = vpop.permute.xlu0 %591  ;;  %vm611_vm15 = vcmp.eq.s32.totalorder %v595_v38, %v3314_v53 }
 0x10a   : > { %vm610_vm0 = vcmp.eq.s32.totalorder %v592_v39, %v3314_v53 }
 0x10b   : > { %vm2525_vm1 = vmpackc.low %vm611_vm15, %vm610_vm0  ;;  %vm1765_vm15 = vcmask 1045509   ;;  %vm1767_vm0 = vcmask 1046534  }
 0x10c   : > { %2739 = vmatmul.mubr.msk.bf16.gmra.mxu1 %vm2525_vm1, %v3000_v57  ;;  %v1154_v40 = vpop.permute.xlu1 %1153  ;;  %vm1769_vm1 = vcmask 1047559  }
 0x10d   : > { %v1151_v41 = vpop.permute.xlu0 %1150  ;;  %vm1174_vm2 = vcmp.eq.s32.totalorder %v1154_v40, %v3314_v53 }
 0x10e   : > { %vm1173_vm3 = vcmp.eq.s32.totalorder %v1151_v41, %v3314_v53 }
 0x10f   : > { %vm2595_vm4 = vmpackc.low %vm1174_vm2, %vm1173_vm3  ;;  %vm3002_vm2 = vmmov 0  }
 0x110   : > { %2770 = vmatprep.mubr.msk.bf16.mxu0 %vm2595_vm4, %v3000_v57  ;;  %v1160_v42 = vpop.permute.xlu1 %1159 }
 0x111   : > { %v1157_v43 = vpop.permute.xlu0 %1156  ;;  %vm1176_vm5 = vcmp.eq.s32.totalorder %v1160_v42, %v3314_v53 }
 0x112   : > { %vm1175_vm6 = vcmp.eq.s32.totalorder %v1157_v43, %v3314_v53 }
 0x113   : > { %vm2597_vm7 = vmpackc.low %vm1176_vm5, %vm1175_vm6 }
 0x114   : > { %2771 = vmatmul.mubr.msk.bf16.gmra.mxu0 %vm2597_vm7, %v3000_v57 }
 0x17d   : > { %v2696_v45 = vpop.f32.mrf.mxu0 }
 0x17f   : > { %v888_v46 = vpop.f32.mrf.mxu0 }
 0x181   : > { %v2697_v47 = vpop.f32.mrf.mxu0 }
 0x183   : > { %v891_v48 = vpop.f32.mrf.mxu0 }
 0x185   : > { %v2700_v49 = vpop.f32.mrf.mxu0 }
 0x187   : > { %v904_v51 = vpop.f32.mrf.mxu0 }
 0x189   : > { %v2701_v52 = vpop.f32.mrf.mxu0 }
 0x18b   : > { %v907_v54 = vpop.f32.mrf.mxu0 }
 0x18d   : > { %v3413_v55 = vpop.f32.mrf.mxu0 }
 0x18f   : > { %v3415_v56 = vpop.f32.mrf.mxu0 }
 0x191   : > { %v3417_v58 = vpop.f32.mrf.mxu0 }
 0x193   : > { %v3419_v57 = vpop.f32.mrf.mxu0 }
 0x195   : > { %v3421_v59 = vpop.f32.mrf.mxu0 }
 0x197   : > { %v3423_v60 = vpop.f32.mrf.mxu0 }
 0x199   : > { %v3425_v62 = vpop.f32.mrf.mxu0 }
 0x19b   : > { %v3427_v0 = vpop.f32.mrf.mxu0 }
 0x19c   : > { %v2728_v61 = vpop.f32.mrf.mxu1 }
 0x19d   : > { %v1042_v4 = vadd.f32 %v2728_v61, %v2696_v45 }
 0x19e   : > { %v1033_v63 = vpop.f32.mrf.mxu1 }
 0x19f   : > { %v1034_v3 = vadd.f32 %v1033_v63, %v888_v46 }
 0x1a0   : > { %v2729_v1 = vpop.f32.mrf.mxu1 }
 0x1a1   : > { %v1045_v7 = vadd.f32 %v2729_v1, %v2697_v47 }
 0x1a2   : > { %v1036_v5 = vpop.f32.mrf.mxu1 }
 0x1a3   : > { %v1037_v11 = vadd.f32 %v1036_v5, %v891_v48 }
 0x1a4   : > { %v2760_v2 = vpop.f32.mrf.mxu0 }
 0x1a5   : > { %v1381_v9 = vadd.f32 %v2760_v2, %v1042_v4 }
 0x1a6   : > { %v1316_v6 = vpop.f32.mrf.mxu0 }
 0x1a7   : > { %v1379_v8 = vadd.f32 %v1316_v6, %v1034_v3  ;;  %v3441_v18 = vadd.f32 %v3432_v12, %v1381_v9 }
 0x1a8   : > { %v2761_v10 = vpop.f32.mrf.mxu0 }
 0x1a9   : > { %v1382_v13 = vadd.f32 %v2761_v10, %v1045_v7  ;;  %v3435_v15 = vadd.f32 %v3432_v12, %v1379_v8  ;;  %v3975_v25 = vmax.f32 %v3441_v18, 0.0 }
 0x1aa   : > { %v1319_v14 = vpop.f32.mrf.mxu0 }
 0x1ab   : > { %v3438_v16 = vadd.f32 %v3432_v12, %v1382_v13  ;;  %v1380_v17 = vadd.f32 %v1319_v14, %v1037_v11  ;;  %v3973_v23 = vmax.f32 %v3435_v15, 0.0 }
 0x1ac   : > { %v2732_v19 = vpop.f32.mrf.mxu1 }
 0x1ad   : > { %v3444_v20 = vadd.f32 %v3432_v12, %v1380_v17  ;;  %v3978_v21 = vmax.f32 %v3438_v16, 0.0  ;;  %v1058_v31 = vadd.f32 %v2732_v19, %v2700_v49 }
 0x1ae   : > { %v1049_v22 = vpop.f32.mrf.mxu1 }
 0x1af   : > { %v3976_v24 = vmax.f32 %v3444_v20, 0.0  ;;  %v1435_v27 = vpack.c.bf16 %v3978_v21, %v3975_v25  ;;  %v1050_v30 = vadd.f32 %v1049_v22, %v904_v51 }
 0x1b0   : > { %v2733_v28 = vpop.f32.mrf.mxu1 }
 0x1b1   : > { %v1434_v26 = vpack.c.bf16 %v3976_v24, %v3973_v23  ;;  %v1061_v34 = vadd.f32 %v2733_v28, %v2701_v52 }
 0x1b2   : > { %v1052_v32 = vpop.f32.mrf.mxu1 }
 0x1b3   : > { %2776 = vmatprep.mubr.msk.bf16.mxu1 %vm1457_vm8, %v1434_v26  ;;  %v1053_v38 = vadd.f32 %v1052_v32, %v907_v54 }
 0x1b4   : > { %v2764_v29 = vpop.f32.mrf.mxu0  ;;  %2777 = vmatmul.mubr.msk.bf16.vlgmr.msra.gmra.mxu1 %vm1457_vm8, %v1435_v27 }
 0x1b5   : > { %v1385_v36 = vadd.f32 %v2764_v29, %v1058_v31 }
 0x1b6   : > { %v1332_v33 = vpop.f32.mrf.mxu0 }
 0x1b7   : > { %v1383_v35 = vadd.f32 %v1332_v33, %v1050_v30  ;;  %v3467_v44 = vadd.f32 %v3432_v12, %v1385_v36 }
 0x1b8   : > { %v2765_v37 = vpop.f32.mrf.mxu0 }
 0x1b9   : > { %v1386_v39 = vadd.f32 %v2765_v37, %v1061_v34  ;;  %v3461_v41 = vadd.f32 %v3432_v12, %v1383_v35  ;;  %v3972_v52 = vmax.f32 %v3467_v44, 0.0 }
 0x1ba   : > { %v1335_v40 = vpop.f32.mrf.mxu0 }
 0x1bb   : > { %v3464_v42 = vadd.f32 %v3432_v12, %v1386_v39  ;;  %v1384_v43 = vadd.f32 %v1335_v40, %v1053_v38  ;;  %v3974_v49 = vmax.f32 %v3461_v41, 0.0 }
 0x1bc   : > { %v2736_v45 = vpop.f32.mrf.mxu1 }
 0x1bd   : > { %v3470_v46 = vadd.f32 %v3432_v12, %v1384_v43  ;;  %v3971_v47 = vmax.f32 %v3464_v42, 0.0  ;;  %v1074_v3 = vadd.f32 %v2736_v45, %v3413_v55 }
 0x1be   : > { %v1065_v48 = vpop.f32.mrf.mxu1 }
 0x1bf   : > { %v3977_v51 = vmax.f32 %v3470_v46, 0.0  ;;  %v1437_v61 = vpack.c.bf16 %v3971_v47, %v3972_v52  ;;  %v1066_v2 = vadd.f32 %v1065_v48, %v3415_v56 }
 0x1c0   : > { %v2737_v63 = vpop.f32.mrf.mxu1 }
 0x1c1   : > { %v1436_v54 = vpack.c.bf16 %v3977_v51, %v3974_v49  ;;  %v1077_v6 = vadd.f32 %v2737_v63, %v3417_v58 }
 0x1c2   : > { %v1068_v4 = vpop.f32.mrf.mxu1 }
 0x1c3   : > { %2780 = vmatprep.mubr.msk.bf16.mxu1 %vm1457_vm8, %v1436_v54  ;;  %v1069_v10 = vadd.f32 %v1068_v4, %v3419_v57 }
 0x1c4   : > { %v2768_v1 = vpop.f32.mrf.mxu0  ;;  %2781 = vmatmul.mubr.msk.bf16.gmra.mxu1 %vm1457_vm8, %v1437_v61 }
 0x1c5   : > { %v1389_v8 = vadd.f32 %v2768_v1, %v1074_v3 }
 0x1c6   : > { %v1348_v5 = vpop.f32.mrf.mxu0 }
 0x1c7   : > { %v1387_v7 = vadd.f32 %v1348_v5, %v1066_v2  ;;  %v3497_v55 = vadd.f32 %v3432_v12, %v1389_v8 }
 0x1c8   : > { %v2769_v9 = vpop.f32.mrf.mxu0 }
 0x1c9   : > { %v1390_v11 = vadd.f32 %v2769_v9, %v1077_v6  ;;  %v3491_v14 = vadd.f32 %v3432_v12, %v1387_v7  ;;  %v3968_v28 = vmax.f32 %v3497_v55, 0.0 }
 0x1ca   : > { %v1351_v13 = vpop.f32.mrf.mxu0 }
 0x1cb   : > { %v3494_v17 = vadd.f32 %v3432_v12, %v1390_v11  ;;  %v1388_v56 = vadd.f32 %v1351_v13, %v1069_v10  ;;  %v3969_v57 = vmax.f32 %v3491_v14, 0.0 }
 0x1cc   : > { %v2740_v19 = vpop.f32.mrf.mxu1 }
 0x1cd   : > { %v3500_v58 = vadd.f32 %v3432_v12, %v1388_v56  ;;  %v3967_v22 = vmax.f32 %v3494_v17, 0.0  ;;  %v1090_v34 = vadd.f32 %v2740_v19, %v3421_v59  ;;  %v3558_v56 = vld [vmem:[%s3959_s5] ss:$0 sm:$0xff] }
 0x1ce   : > { %v1081_v26 = vpop.f32.mrf.mxu1 }
 0x1cf   : > { %v3970_v27 = vmax.f32 %v3500_v58, 0.0  ;;  %v1439_v30 = vpack.c.bf16 %v3967_v22, %v3968_v28  ;;  %v1082_v33 = vadd.f32 %v1081_v26, %v3423_v60 }
 0x1d0   : > { %v2741_v31 = vpop.f32.mrf.mxu1 }
 0x1d1   : > { %v1438_v29 = vpack.c.bf16 %v3970_v27, %v3969_v57  ;;  %v1093_v37 = vadd.f32 %v2741_v31, %v3425_v62 }
 0x1d2   : > { %v1084_v35 = vpop.f32.mrf.mxu1 }
 0x1d3   : > { %2784 = vmatprep.mubr.msk.bf16.mxu1 %vm1457_vm8, %v1438_v29  ;;  %v1085_v43 = vadd.f32 %v1084_v35, %v3427_v0 }
 0x1d4   : > { %v2772_v32 = vpop.f32.mrf.mxu0  ;;  %2785 = vmatmul.mubr.msk.bf16.gmra.mxu1 %vm1457_vm8, %v1439_v30 }
 0x1d5   : > { %v1393_v39 = vadd.f32 %v2772_v32, %v1090_v34 }
 0x1d6   : > { %v1364_v36 = vpop.f32.mrf.mxu0 }
 0x1d7   : > { %v1391_v38 = vadd.f32 %v1364_v36, %v1082_v33  ;;  %v3527_v59 = vadd.f32 %v3432_v12, %v1393_v39 }
 0x1d8   : > { %v2773_v40 = vpop.f32.mrf.mxu0 }
 0x1d9   : > { %v1394_v45 = vadd.f32 %v2773_v40, %v1093_v37  ;;  %v3521_v54 = vadd.f32 %v3432_v12, %v1391_v38  ;;  %v3964_v2 = vmax.f32 %v3527_v59, 0.0 }
 0x1da   : > { %v1367_v48 = vpop.f32.mrf.mxu0 }
 0x1db   : > { %v3524_v61 = vadd.f32 %v3432_v12, %v1394_v45  ;;  %v1392_v60 = vadd.f32 %v1367_v48, %v1085_v43  ;;  %v3966_v1 = vmax.f32 %v3521_v54, 0.0 }
 0x1dd   : > { %v3530_v63 = vadd.f32 %v3432_v12, %v1392_v60  ;;  %v3963_v62 = vmax.f32 %v3524_v61, 0.0  ;;  %v3549_v12 = vld [vmem:[%s3958_s4] ss:$0 sm:$0xff] }
 0x1df   : > { %v3965_v0 = vmax.f32 %v3530_v63, 0.0  ;;  %v1441_v4 = vpack.c.bf16 %v3963_v62, %v3964_v2 }
 0x1e1   : > { %v1440_v3 = vpack.c.bf16 %v3965_v0, %v3966_v1 }
 0x1e3   : > { %2788 = vmatprep.mubr.msk.bf16.mxu1 %vm1457_vm8, %v1440_v3 }
 0x1e4   : > { %2789 = vmatmul.mubr.msk.bf16.gmra.mxu1 %vm1457_vm8, %v1441_v4 }
 0x274   : > { %v2778_v5 = vpop.f32.mrf.mxu1 }
 0x275   : > { %v1525_v6 = vadd.f32 %v2778_v5, %v3549_v12 }
 0x276   : > { %v1516_v7 = vpop.f32.mrf.mxu1 }
 0x277   : > { %2871 = vtanh.f32 %v1525_v6  ;;  %v1517_v8 = vadd.f32 %v3549_v12, %v1516_v7 }
 0x278   : > { %v2779_v9 = vpop.f32.mrf.mxu1 }
 0x279   : > { %2873 = vtanh.f32 %v1517_v8  ;;  %v1528_v10 = vadd.f32 %v2779_v9, %v3549_v12 }
 0x27a   : > { %v1519_v11 = vpop.f32.mrf.mxu1 }
 0x27b   : > { %2875 = vtanh.f32 %v1528_v10  ;;  %v1520_v13 = vadd.f32 %v3549_v12, %v1519_v11 }
 0x27d   : > { %2877 = vtanh.f32 %v1520_v13 }
 0x284   : > { %v2872_v19 = vpop.eup %2871  ;;  %v2782_v26 = vpop.f32.mrf.mxu1 }
 0x285   : > { %v1541_v29 = vadd.f32 %v2782_v26, %v3549_v12  ;;  %v1604_v30 = vmul.f32 %v2872_v19, %v3558_v56 }
 0x286   : > { %v2874_v31 = vpop.eup %2873  ;;  %v1532_v32 = vpop.f32.mrf.mxu1 }
 0x287   : > { %2879 = vtanh.f32 %v1541_v29  ;;  %v1533_v33 = vadd.f32 %v3549_v12, %v1532_v32  ;;  %v1625_v34 = vsel %vm1618_vm9, %v1604_v30, 0.0  ;;  %v1602_v35 = vmul.f32 %v2874_v31, %v3558_v56 }
 0x288   : > { %v2876_v36 = vpop.eup %2875  ;;  %1626 = vadd.xlane.f32.xlu0 %v1625_v34  ;;  %v2783_v37 = vpop.f32.mrf.mxu1 }
 0x289   : > { %2881 = vtanh.f32 %v1533_v33  ;;  %v1544_v38 = vadd.f32 %v2783_v37, %v3549_v12  ;;  %v1619_v43 = vsel %vm1618_vm9, %v1602_v35, 0.0  ;;  %v1605_v60 = vmul.f32 %v2876_v36, %v3558_v56 }
 0x28a   : > { %v2878_v39 = vpop.eup %2877  ;;  %v1535_v40 = vpop.f32.mrf.mxu1 }
 0x28b   : > { %2883 = vtanh.f32 %v1544_v38  ;;  %v1536_v45 = vadd.f32 %v3549_v12, %v1535_v40  ;;  %v1603_v48 = vmul.f32 %v2878_v39, %v3558_v56  ;;  %v1628_v4 = vsel %vm1618_vm9, %v1605_v60, 0.0 }
 0x28c   : > { %1620 = vadd.xlane.f32.xlu0 %v1619_v43 }
 0x28d   : > { %2885 = vtanh.f32 %v1536_v45  ;;  %v1622_v3 = vsel %vm1618_vm9, %v1603_v48, 0.0 }
 0x28e   : > { %1623 = vadd.xlane.f32.xlu1 %v1622_v3 }
 0x290   : > { %1629 = vadd.xlane.f32.xlu0 %v1628_v4 }
 0x294   : > { %v2880_v5 = vpop.eup %2879  ;;  %v2786_v6 = vpop.f32.mrf.mxu1 }
 0x295   : > { %v1557_v7 = vadd.f32 %v2786_v6, %v3549_v12  ;;  %v1608_v8 = vmul.f32 %v2880_v5, %v3558_v56 }
 0x296   : > { %v2882_v9 = vpop.eup %2881  ;;  %v1548_v10 = vpop.f32.mrf.mxu1 }
 0x297   : > { %2887 = vtanh.f32 %v1557_v7  ;;  %v1549_v11 = vadd.f32 %v3549_v12, %v1548_v10  ;;  %v1637_v13 = vsel %vm1618_vm9, %v1608_v8, 0.0  ;;  %v1606_v19 = vmul.f32 %v2882_v9, %v3558_v56 }
 0x298   : > { %v2884_v26 = vpop.eup %2883  ;;  %v2787_v29 = vpop.f32.mrf.mxu1  ;;  %1638 = vadd.xlane.f32.xlu1 %v1637_v13 }
 0x299   : > { %2889 = vtanh.f32 %v1549_v11  ;;  %v1560_v30 = vadd.f32 %v2787_v29, %v3549_v12  ;;  %v1609_v31 = vmul.f32 %v2884_v26, %v3558_v56  ;;  %v1631_v34 = vsel %vm1618_vm9, %v1606_v19, 0.0 }
 0x29a   : > { %v2886_v32 = vpop.eup %2885  ;;  %v1551_v33 = vpop.f32.mrf.mxu1 }
 0x29b   : > { %2891 = vtanh.f32 %v1560_v30  ;;  %v1552_v35 = vadd.f32 %v3549_v12, %v1551_v33  ;;  %v1640_v36 = vsel %vm1618_vm9, %v1609_v31, 0.0  ;;  %v1607_v37 = vmul.f32 %v2886_v32, %v3558_v56 }
 0x29c   : > { %1632 = vadd.xlane.f32.xlu1 %v1631_v34  ;;  %1641 = vadd.xlane.f32.xlu0 %v1640_v36 }
 0x29d   : > { %2893 = vtanh.f32 %v1552_v35  ;;  %v1634_v38 = vsel %vm1618_vm9, %v1607_v37, 0.0 }
 0x2a0   : > { %1635 = vadd.xlane.f32.xlu0 %v1634_v38 }
 0x2a4   : > { %v2888_v39 = vpop.eup %2887  ;;  %v2790_v40 = vpop.f32.mrf.mxu1 }
 0x2a5   : > { %v1573_v43 = vadd.f32 %v2790_v40, %v3549_v12  ;;  %v1612_v45 = vmul.f32 %v2888_v39, %v3558_v56 }
 0x2a6   : > { %v2890_v48 = vpop.eup %2889  ;;  %v1564_v60 = vpop.f32.mrf.mxu1 }
 0x2a7   : > { %v1565_v3 = vadd.f32 %v3549_v12, %v1564_v60  ;;  %v1649_v4 = vsel %vm1618_vm9, %v1612_v45, 0.0  ;;  %v1610_v5 = vmul.f32 %v2890_v48, %v3558_v56  ;;  %2895 = vtanh.f32 %v1573_v43 }
 0x2a8   : > { %v2892_v6 = vpop.eup %2891  ;;  %1650 = vadd.xlane.f32.xlu1 %v1649_v4  ;;  %v2791_v7 = vpop.f32.mrf.mxu1 }
 0x2a9   : > { %2897 = vtanh.f32 %v1565_v3  ;;  %v1576_v8 = vadd.f32 %v2791_v7, %v3549_v12  ;;  %v1613_v9 = vmul.f32 %v2892_v6, %v3558_v56  ;;  %v1643_v19 = vsel %vm1618_vm9, %v1610_v5, 0.0 }
 0x2aa   : > { %v2894_v10 = vpop.eup %2893  ;;  %v1567_v11 = vpop.f32.mrf.mxu1  ;;  %v3621_v7 = vshrl.u32 %v530_v50, 7 }
 0x2ab   : > { %v1568_v13 = vadd.f32 %v3549_v12, %v1567_v11  ;;  %v1652_v26 = vsel %vm1618_vm9, %v1613_v9, 0.0  ;;  %v1611_v29 = vmul.f32 %v2894_v10, %v3558_v56  ;;  %2899 = vtanh.f32 %v1576_v8 }
 0x2ac   : > { %1644 = vadd.xlane.f32.xlu1 %v1643_v19  ;;  %1653 = vadd.xlane.f32.xlu0 %v1652_v26  ;;  %v1687_v8 = vadd.s32 4294967288, %v3314_v53  ;;  %v3630_v11 = vsub.s32 %v3314_v53, %v3621_v7  ;;  %v1786_v62 = vsub.s32 2, %v3621_v7  ;;  %v3980_v22 = vsub.s32 5, %v3621_v7 }
 0x2ad   : > { %2901 = vtanh.f32 %v1568_v13  ;;  %v1646_v30 = vsel %vm1618_vm9, %v1611_v29, 0.0 }
 0x2ae   : > { %v3633_v13 = vsub.s32 %v1687_v8, %v3621_v7 }
 0x2b0   : > { %1647 = vadd.xlane.f32.xlu0 %v1646_v30 }
 0x2b4   : > { %v2896_v31 = vpop.eup %2895 }
 0x2b5   : > { %v1616_v35 = vmul.f32 %v2896_v31, %v3558_v56 }
 0x2b6   : > { %v2898_v32 = vpop.eup %2897 }
 0x2b7   : > { %v1614_v33 = vmul.f32 %v2898_v32, %v3558_v56  ;;  %v1661_v39 = vsel %vm1618_vm9, %v1616_v35, 0.0 }
 0x2b8   : > { %v2900_v34 = vpop.eup %2899 }
 0x2b9   : > { %v1655_v12 = vsel %vm1618_vm9, %v1614_v33, 0.0  ;;  %v1617_v40 = vmul.f32 %v2900_v34, %v3558_v56 }
 0x2ba   : > { %v2902_v36 = vpop.eup %2901  ;;  %1656 = vadd.xlane.f32.xlu1 %v1655_v12 }
 0x2bb   : > { %v1615_v37 = vmul.f32 %v2902_v36, %v3558_v56  ;;  %v1664_v43 = vsel %vm1618_vm9, %v1617_v40, 0.0 }
 0x2bd   : > { %v1658_v38 = vsel %vm1618_vm9, %v1615_v37, 0.0 }
 0x2be   : > { %1659 = vadd.xlane.f32.xlu0 %v1658_v38  ;;  %1662 = vadd.xlane.f32.xlu1 %v1661_v39 }
 0x2c2   : > { %1665 = vadd.xlane.f32.xlu0 %v1664_v43 }
 0x311   : > { %v3604_v45 = vpop.xlane.xlu0 %1626 }
 0x312   : > { %v1697_v29 = vrot.slane %v3604_v45, %v3630_v11 }
 0x315   : > { %v3606_v48 = vpop.xlane.xlu0 %1620 }
 0x316   : > { %v1686_v32 = vrot.slane %v3606_v48, %v3630_v11 }
 0x317   : > { %v3608_v60 = vpop.xlane.xlu1 %1623 }
 0x318   : > { %v1691_v30 = vrot.slane %v3608_v60, %v3633_v13 }
 0x319   : > { %v3610_v3 = vpop.xlane.xlu0 %1629 }
 0x31a   : > { %v1701_v19 = vrot.slane %v3610_v3, %v3633_v13  ;;  %v1693_v36 = vsel %vm1692_vm10, %v1691_v30, %v1686_v32 }
 0x31c   : > { %v1702_v33 = vsel %vm1692_vm10, %v1701_v19, %v1697_v29 }
 0x31d   : > { %v1758_v38 = vsel %vm1757_vm11, %v1702_v33, %v1693_v36 }
 0x321   : > { %v3612_v4 = vpop.xlane.xlu1 %1638 }
 0x322   : > { %v1715_v40 = vrot.slane %v3612_v4, %v3630_v11 }
 0x325   : > { %v3614_v5 = vpop.xlane.xlu0 %1641  ;;  %v3616_v6 = vpop.xlane.xlu1 %1632 }
 0x326   : > { %v1706_v53 = vrot.slane %v3616_v6, %v3630_v11  ;;  %v1719_v37 = vrot.slane %v3614_v5, %v3633_v13 }
 0x329   : > { %v3618_v56 = vpop.xlane.xlu0 %1635 }
 0x32a   : > { %v1710_v50 = vrot.slane %v3618_v56, %v3633_v13 }
 0x32c   : > { %v1711_v34 = vsel %vm1692_vm10, %v1710_v50, %v1706_v53  ;;  %v1720_v50 = vsel %vm1692_vm10, %v1719_v37, %v1715_v40 }
 0x32d   : > { %v1760_v43 = vsel %vm1759_vm12, %v1711_v34, %v1758_v38 }
 0x32e   : > { %v1762_v33 = vsel %vm1761_vm13, %v1720_v50, %v1760_v43 }
 0x331   : > { %v3624_v9 = vpop.xlane.xlu1 %1650 }
 0x332   : > { %v1733_v34 = vrot.slane %v3624_v9, %v3630_v11 }
 0x335   : > { %v3626_v10 = vpop.xlane.xlu0 %1653  ;;  %v3639_v26 = vpop.xlane.xlu1 %1644 }
 0x336   : > { %v1724_v39 = vrot.slane %v3639_v26, %v3630_v11  ;;  %v1737_v29 = vrot.slane %v3626_v10, %v3633_v13 }
 0x338   : > { %v1738_v38 = vsel %vm1692_vm10, %v1737_v29, %v1733_v34  ;;  %v1778_v29 = vsub.s32 0, %v3621_v7 }
 0x339   : > { %v3645_v31 = vpop.xlane.xlu0 %1647 }
 0x33a   : > { %v1728_v12 = vrot.slane %v3645_v31, %v3633_v13 }
 0x33c   : > { %v1729_v8 = vsel %vm1692_vm10, %v1728_v12, %v1724_v39 }
 0x33d   : > { %v1764_v12 = vsel %vm1763_vm14, %v1729_v8, %v1762_v33 }
 0x33e   : > { %v1766_v43 = vsel %vm1765_vm15, %v1738_v38, %v1764_v12 }
 0x343   : > { %v3655_v35 = vpop.xlane.xlu1 %1656 }
 0x344   : > { %v1742_v53 = vrot.slane %v3655_v35, %v3630_v11 }
 0x347   : > { %v3667_v19 = vpop.xlane.xlu0 %1659  ;;  %v3676_v32 = vpop.xlane.xlu1 %1662 }
 0x348   : > { %v1746_v30 = vrot.slane %v3667_v19, %v3633_v13  ;;  %v1751_v39 = vrot.slane %v3676_v32, %v3630_v11 }
 0x34a   : > { %v1747_v37 = vsel %vm1692_vm10, %v1746_v30, %v1742_v53  ;;  %v1782_v53 = vsub.s32 1, %v3621_v7 }
 0x34b   : > { %v3682_v36 = vpop.xlane.xlu0 %1665  ;;  %v1768_v8 = vsel %vm1767_vm0, %v1747_v37, %v1766_v43 }
 0x34c   : > { %v1755_v40 = vrot.slane %v3682_v36, %v3633_v13 }
 0x34e   : > { %v1756_v50 = vsel %vm1692_vm10, %v1755_v40, %v1751_v39  ;;  %v1790_v39 = vsub.s32 3, %v3621_v7 }
 0x34f   : > { %v1770_v33 = vsel %vm1769_vm1, %v1756_v50, %v1768_v8 }
 0x350   : > { %v1772_v30 = vsel %vm1457_vm8, %v1770_v33, -inf }
 0x351   : > { %1773 = vmax.xlane.f32.xlu1 %v1772_v30  ;;  %v1794_v30 = vsub.s32 4, %v3621_v7 }
 0x3da   : > { %v1774_v34 = vpop.xlane.xlu1 %1773 }
 0x3db   : > { %v1779_v2 = vrot.slane %v1774_v34, %v1778_v29  ;;  %v1783_v12 = vrot.slane %v1774_v34, %v1782_v53  ;;  %v1787_v40 = vrot.slane %v1774_v34, %v1786_v62  ;;  %v1791_v0 = vrot.slane %v1774_v34, %v1790_v39 }
 0x3dd   : > { %v1816_v37 = vsub.f32 %v3606_v48, %v1779_v2  ;;  %v1817_v38 = vsub.f32 %v3608_v60, %v1779_v2  ;;  %v1819_v43 = vsub.f32 %v3610_v3, %v1783_v12  ;;  %v1818_v50 = vsub.f32 %v3604_v45, %v1783_v12 }
 0x3de   : > { %v1821_v48 = vsub.f32 %v3618_v56, %v1787_v40  ;;  %v1820_v60 = vsub.f32 %v3616_v6, %v1787_v40  ;;  %v1795_v45 = vrot.slane %v1774_v34, %v1794_v30  ;;  %v1823_v3 = vsub.f32 %v3614_v5, %v1791_v0 }
 0x3df   : > { %v1832_v8 = vmul.f32 1.442695, %v1816_v37  ;;  %v1834_v33 = vmul.f32 1.442695, %v1817_v38  ;;  %v1838_v2 = vmul.f32 1.442695, %v1819_v43  ;;  %v1822_v37 = vsub.f32 %v3612_v4, %v1791_v0 }
 0x3e0   : > { %v1836_v1 = vmul.f32 1.442695, %v1818_v50  ;;  %v1842_v12 = vmul.f32 1.442695, %v1821_v48  ;;  %v1840_v38 = vmul.f32 1.442695, %v1820_v60  ;;  %v1799_v6 = vrot.slane %v1774_v34, %v3980_v22 }
 0x3e1   : > { %2903 = vpow2.f32 %v1832_v8  ;;  %v3979_v56 = vsub.s32 6, %v3621_v7  ;;  %v1825_v40 = vsub.f32 %v3645_v31, %v1795_v45  ;;  %v1846_v43 = vmul.f32 1.442695, %v1823_v3 }
 0x3e2   : > { %2905 = vpow2.f32 %v1834_v33  ;;  %v1824_v50 = vsub.f32 %v3639_v26, %v1795_v45  ;;  %v1844_v8 = vmul.f32 1.442695, %v1822_v37  ;;  %v1806_v5 = vsub.s32 7, %v3621_v7 }
 0x3e3   : > { %2907 = vpow2.f32 %v1838_v2  ;;  %v1803_v0 = vrot.slane %v1774_v34, %v3979_v56  ;;  %v1850_v4 = vmul.f32 1.442695, %v1825_v40  ;;  %v1826_v48 = vsub.f32 %v3624_v9, %v1799_v6 }
 0x3e4   : > { %2909 = vpow2.f32 %v1836_v1  ;;  %v1827_v1 = vsub.f32 %v3626_v10, %v1799_v6  ;;  %v1848_v31 = vmul.f32 1.442695, %v1824_v50  ;;  %v1807_v26 = vrot.slane %v1774_v34, %v1806_v5 }
 0x3e5   : > { %2911 = vpow2.f32 %v1842_v12  ;;  %v1829_v60 = vsub.f32 %v3667_v19, %v1803_v0  ;;  %v1828_v3 = vsub.f32 %v3655_v35, %v1803_v0  ;;  %v1852_v9 = vmul.f32 1.442695, %v1826_v48 }
 0x3e6   : > { %2913 = vpow2.f32 %v1840_v38  ;;  %v1854_v10 = vmul.f32 1.442695, %v1827_v1  ;;  %v1831_v37 = vsub.f32 %v3682_v36, %v1807_v26  ;;  %v1830_v19 = vsub.f32 %v3676_v32, %v1807_v26 }
 0x3e7   : > { %2915 = vpow2.f32 %v1846_v43  ;;  %v1858_v34 = vmul.f32 1.442695, %v1829_v60  ;;  %v1856_v6 = vmul.f32 1.442695, %v1828_v3 }
 0x3e8   : > { %2917 = vpow2.f32 %v1844_v8  ;;  %v1862_v35 = vmul.f32 1.442695, %v1831_v37  ;;  %v1860_v36 = vmul.f32 1.442695, %v1830_v19 }
 0x3e9   : > { %2919 = vpow2.f32 %v1850_v4 }
 0x3ea   : > { %2921 = vpow2.f32 %v1848_v31 }
 0x3eb   : > { %2923 = vpow2.f32 %v1854_v10 }
 0x3ec   : > { %2925 = vpow2.f32 %v1852_v9 }
 0x3ed   : > { %2927 = vpow2.f32 %v1858_v34 }
 0x3ee   : > { %v3728_v33 = vpop.eup %2903  ;;  %2929 = vpow2.f32 %v1856_v6 }
 0x3ef   : > { %v3731_v2 = vpop.eup %2905  ;;  %1881 = vperm.xlu0 %2843, %v3728_v33   ;;  %2931 = vpow2.f32 %v1862_v35 }
 0x3f0   : > { %1884 = vperm.xlu1 %2844, %v3731_v2   ;;  %v3738_v45 = vpop.eup %2907  ;;  %2933 = vpow2.f32 %v1860_v36 }
 0x3f1   : > { %v3741_v12 = vpop.eup %2909 }
 0x3f2   : > { %v3746_v38 = vpop.eup %2911 }
 0x3f3   : > { %1890 = vperm.xlu0 %2843, %v3738_v45   ;;  %v3749_v40 = vpop.eup %2913 }
 0x3f4   : > { %1887 = vperm.xlu1 %2844, %v3741_v12   ;;  %v3753_v43 = vpop.eup %2915 }
 0x3f5   : > { %v3755_v50 = vpop.eup %2917 }
 0x3f6   : > { %v3759_v32 = vpop.eup %2919 }
 0x3f7   : > { %1896 = vperm.xlu0 %2843, %v3746_v38   ;;  %v3761_v8 = vpop.eup %2921 }
 0x3f8   : > { %1893 = vperm.xlu1 %2844, %v3749_v40   ;;  %v3765_v0 = vpop.eup %2923 }
 0x3f9   : > { %v3767_v1 = vpop.eup %2925 }
 0x3fa   : > { %v3771_v4 = vpop.eup %2927 }
 0x3fb   : > { %1902 = vperm.xlu0 %2843, %v3753_v43   ;;  %v3773_v48 = vpop.eup %2929 }
 0x3fc   : > { %1899 = vperm.xlu1 %2844, %v3755_v50   ;;  %v3777_v31 = vpop.eup %2931 }
 0x3fd   : > { %v2934_v26 = vpop.eup %2933 }
 0x3ff   : > { %1908 = vperm.xlu0 %2843, %v3759_v32  }
 0x400   : > { %1905 = vperm.xlu1 %2844, %v3761_v8  }
 0x403   : > { %1914 = vperm.xlu0 %2843, %v3765_v0  }
 0x404   : > { %1911 = vperm.xlu1 %2844, %v3767_v1  }
 0x407   : > { %1920 = vperm.xlu0 %2843, %v3771_v4  }
 0x408   : > { %1917 = vperm.xlu1 %2844, %v3773_v48  }
 0x40b   : > { %1926 = vperm.xlu0 %2843, %v3777_v31  }
 0x40c   : > { %1923 = vperm.xlu1 %2844, %v2934_v26  }
 0x46a   : > { %v1882_v60 = vpop.permute.xlu0 %1881 }
 0x46b   : > { %v1885_v10 = vpop.permute.xlu1 %1884  ;;  %v1931_v25 = vrot.slane %v1882_v60, %v3630_v11 }
 0x46c   : > { %v1935_v49 = vrot.slane %v1885_v10, %v3633_v13 }
 0x46e   : > { %v1891_v3 = vpop.permute.xlu0 %1890 }
 0x46f   : > { %v1888_v9 = vpop.permute.xlu1 %1887  ;;  %v1944_v57 = vrot.slane %v1891_v3, %v3633_v13 }
 0x470   : > { %v1940_v28 = vrot.slane %v1888_v9, %v3630_v11 }
 0x472   : > { %v1897_v37 = vpop.permute.xlu0 %1896  ;;  %v1945_v3 = vsel %vm1692_vm10, %v1944_v57, %v1940_v28 }
 0x473   : > { %v1894_v34 = vpop.permute.xlu1 %1893  ;;  %v1953_v52 = vrot.slane %v1897_v37, %v3633_v13 }
 0x474   : > { %v1949_v47 = vrot.slane %v1894_v34, %v3630_v11 }
 0x476   : > { %v1903_v19 = vpop.permute.xlu0 %1902  ;;  %v1954_v22 = vsel %vm1692_vm10, %v1953_v52, %v1949_v47 }
 0x477   : > { %v1900_v6 = vpop.permute.xlu1 %1899  ;;  %v1962_v51 = vrot.slane %v1903_v19, %v3633_v13 }
 0x478   : > { %v1958_v24 = vrot.slane %v1900_v6, %v3630_v11  ;;  %v1936_v6 = vsel %vm1692_vm10, %v1935_v49, %v1931_v25 }
 0x47a   : > { %v1909_v35 = vpop.permute.xlu0 %1908  ;;  %v1963_v19 = vsel %vm1692_vm10, %v1962_v51, %v1958_v24 }
 0x47b   : > { %v1906_v36 = vpop.permute.xlu1 %1905  ;;  %v1971_v9 = vrot.slane %v1909_v35, %v3633_v13  ;;  %v2000_v35 = vsel %vm1757_vm11, %v1945_v3, %v1936_v6 }
 0x47c   : > { %v1967_v21 = vrot.slane %v1906_v36, %v3630_v11 }
 0x47e   : > { %v1915_v27 = vpop.permute.xlu0 %1914  ;;  %v1972_v57 = vsel %vm1692_vm10, %v1971_v9, %v1967_v21 }
 0x47f   : > { %v1912_v23 = vpop.permute.xlu1 %1911  ;;  %v1980_v34 = vrot.slane %v1915_v27, %v3633_v13 }
 0x480   : > { %v1976_v56 = vrot.slane %v1912_v23, %v3630_v11  ;;  %v2001_v23 = vsel %vm1759_vm12, %v1954_v22, %v2000_v35 }
 0x481   : > { %v2002_v47 = vsel %vm1761_vm13, %v1963_v19, %v2001_v23  ;;  %v3001_v23 = vmov 0.0  }
 0x482   : > { %v1921_v37 = vpop.permute.xlu0 %1920  ;;  %v1981_v27 = vsel %vm1692_vm10, %v1980_v34, %v1976_v56  ;;  %v2003_v24 = vsel %vm1763_vm14, %v1972_v57, %v2002_v47  ;;  %2792 = vmatprep.subr.bf16.mxu0 %v3001_v23  ;;  %2794 = vmatprep.mubr.msk.bf16.mxu0 %vm3002_vm2, %v3001_v23 }
 0x483   : > { %v1918_v10 = vpop.permute.xlu1 %1917  ;;  %v1989_v60 = vrot.slane %v1921_v37, %v3633_v13  ;;  %v2004_v51 = vsel %vm1765_vm15, %v1981_v27, %v2003_v24  ;;  %v3987_v24 = vmax.f32 %v3444_v20, 0.0 }
 0x484   : > { %v1985_v36 = vrot.slane %v1918_v10, %v3630_v11 }
 0x486   : > { %v1927_v28 = vpop.permute.xlu0 %1926  ;;  %v1990_v52 = vsel %vm1692_vm10, %v1989_v60, %v1985_v36 }
 0x487   : > { %v1924_v37 = vpop.permute.xlu1 %1923  ;;  %v1998_v25 = vrot.slane %v1927_v28, %v3633_v13  ;;  %v2005_v22 = vsel %vm1767_vm0, %v1990_v52, %v2004_v51  ;;  %v3985_v52 = vmax.f32 %v3438_v16, 0.0  ;;  %v3988_v51 = vmax.f32 %v3441_v18, 0.0 }
 0x488   : > { %v1994_v49 = vrot.slane %v1924_v37, %v3630_v11  ;;  %v3986_v37 = vmax.f32 %v3470_v46, 0.0  ;;  %v3993_v18 = vmax.f32 %v3500_v58, 0.0 }
 0x48a   : > { %v1999_v21 = vsel %vm1692_vm10, %v1998_v25, %v1994_v49 }
 0x48b   : > { %v2006_v56 = vsel %vm1769_vm1, %v1999_v21, %v2005_v22 }
 0x48c   : > { %v2008_v9 = vsel %vm1457_vm8, %v2006_v56, 0.0  ;;  %v3989_v56 = vmax.f32 %v3461_v41, 0.0 }
 0x48d   : > { %2009 = vadd.xlane.f32.xlu1 %v2008_v9 }
 0x516   : > { %v2010_v3 = vpop.xlane.xlu1 %2009 }
 0x517   : > { %2935 = vrcp.f32 %v2010_v3 }
 0x524   : > { %v2936_v34 = vpop.eup %2935 }
 0x525   : > { %v2032_v13 = vrot.slane %v2936_v34, %v1794_v30  ;;  %v2016_v11 = vrot.slane %v2936_v34, %v1778_v29  ;;  %v2044_v6 = vrot.slane %v2936_v34, %v1806_v5  ;;  %v2020_v35 = vrot.slane %v2936_v34, %v1782_v53 }
 0x527   : > { %v2062_v10 = vmul.f32 %v3759_v32, %v2032_v13  ;;  %v2053_v60 = vmul.f32 %v3728_v33, %v2016_v11  ;;  %v2067_v19 = vmul.f32 %v2934_v26, %v2044_v6  ;;  %v2054_v36 = vmul.f32 %v3731_v2, %v2016_v11 }
 0x528   : > { %v2055_v30 = vmul.f32 %v3741_v12, %v2020_v35  ;;  %v2056_v29 = vmul.f32 %v3738_v45, %v2020_v35  ;;  %v2024_v33 = vrot.slane %v2936_v34, %v1786_v62  ;;  %v2028_v2 = vrot.slane %v2936_v34, %v1790_v39 }
 0x529   : > { %2116 = vperm.xlu1 %2844, %v2062_v10   ;;  %2071 = vperm.xlu0 %2843, %v2053_v60   ;;  %v2061_v45 = vmul.f32 %v3761_v8, %v2032_v13  ;;  %v3983_v62 = vsub.s32 5, %v3621_v7  ;;  %v3984_v39 = vsub.s32 6, %v3621_v7  ;;  %v2068_v8 = vmul.f32 %v3777_v31, %v2044_v6 }
 0x52a   : > { %v2057_v5 = vmul.f32 %v3749_v40, %v2024_v33  ;;  %v2058_v32 = vmul.f32 %v3746_v38, %v2024_v33  ;;  %v2059_v53 = vmul.f32 %v3755_v50, %v2028_v2  ;;  %v2060_v12 = vmul.f32 %v3753_v43, %v2028_v2 }
 0x52b   : > { %v2036_v26 = vrot.slane %v2936_v34, %v3983_v62  ;;  %v2040_v57 = vrot.slane %v2936_v34, %v3984_v39  ;;  %v3990_v34 = vmax.f32 %v3435_v15, 0.0  ;;  %v3991_v11 = vmax.f32 %v3467_v44, 0.0 }
 0x52c   : > { %v3992_v10 = vmax.f32 %v3464_v42, 0.0  ;;  %v3994_v33 = vmax.f32 %v3491_v14, 0.0 }
 0x52d   : > { %2141 = vperm.xlu1 %2844, %v2067_v19   ;;  %2076 = vperm.xlu0 %2843, %v2054_v36   ;;  %v2063_v40 = vmul.f32 %v3767_v1, %v2036_v26  ;;  %v2064_v38 = vmul.f32 %v3765_v0, %v2036_v26  ;;  %v2065_v50 = vmul.f32 %v3773_v48, %v2040_v57  ;;  %v2870_v1 = vld [vmem:[%s3960_s6] sm:$0xff]  }
 0x52e   : > { %v2066_v43 = vmul.f32 %v3771_v4, %v2040_v57  ;;  %2793 = vmatpush3.bf16.msra.mxu0 %v2870_v1  ;;  %v3995_v57 = vmax.f32 %v3497_v55, 0.0  ;;  %v3996_v1 = vmax.f32 %v3494_v17, 0.0 }
 0x531   : > { %2081 = vperm.xlu0 %2843, %v2055_v30  }
 0x535   : > { %2086 = vperm.xlu0 %2843, %v2056_v29  }
 0x539   : > { %2091 = vperm.xlu0 %2843, %v2057_v5  }
 0x53d   : > { %2096 = vperm.xlu0 %2843, %v2058_v32  }
 0x541   : > { %2101 = vperm.xlu0 %2843, %v2059_v53  }
 0x545   : > { %2106 = vperm.xlu0 %2843, %v2060_v12  }
 0x549   : > { %2111 = vperm.xlu0 %2843, %v2061_v45  }
 0x54d   : > { %2121 = vperm.xlu0 %2843, %v2063_v40  }
 0x551   : > { %2126 = vperm.xlu0 %2843, %v2064_v38  }
 0x555   : > { %2131 = vperm.xlu0 %2843, %v2065_v50  }
 0x559   : > { %2136 = vperm.xlu0 %2843, %v2066_v43  }
 0x55d   : > { %2146 = vperm.xlu0 %2843, %v2068_v8  }
 0x5a4   : > { %v2072_v7 = vpop.permute.xlu0 %2071  ;;  %v2117_v22 = vpop.permute.xlu1 %2116 }
 0x5a5   : > { %v2149_v13 = vmul.f32 %v2072_v7, %v3990_v34  ;;  %v2158_v6 = vmul.f32 %v2117_v22, %v3993_v18 }
 0x5a7   : > { %v2165_v44 = vsel %vm1457_vm8, %v2149_v13, 0.0  ;;  %v2202_v2 = vsel %vm1457_vm8, %v2158_v6, 0.0 }
 0x5a8   : > { %v2077_v0 = vpop.permute.xlu0 %2076  ;;  %v2142_v17 = vpop.permute.xlu1 %2141 }
 0x5a9   : > { %v2150_v49 = vmul.f32 %v2077_v0, %v3987_v24 }
 0x5ab   : > { %v2166_v41 = vsel %vm1457_vm8, %v2150_v49, 0.0  ;;  %v3997_v49 = vmax.f32 %v3521_v54, 0.0 }
 0x5ac   : > { %v2082_v27 = vpop.permute.xlu0 %2081  ;;  %v2167_v58 = vadd.f32 %v2166_v41, %v2165_v44 }
 0x5ad   : > { %v2151_v21 = vmul.f32 %v2082_v27, %v3988_v51 }
 0x5ae   : > { %v2168_v40 = vrot.slane %v2167_v58, 4 }
 0x5af   : > { %v2174_v19 = vsel %vm1457_vm8, %v2151_v21, 0.0 }
 0x5b0   : > { %v2087_v48 = vpop.permute.xlu0 %2086  ;;  %v2169_v7 = vadd.f32 %v2168_v40, %v2167_v58 }
 0x5b1   : > { %v2152_v31 = vmul.f32 %v2087_v48, %v3985_v52 }
 0x5b3   : > { %v2175_v16 = vsel %vm1457_vm8, %v2152_v31, 0.0 }
 0x5b4   : > { %v2092_v28 = vpop.permute.xlu0 %2091  ;;  %v2176_v36 = vadd.f32 %v2175_v16, %v2174_v19 }
 0x5b5   : > { %v2153_v9 = vmul.f32 %v2092_v28, %v3989_v56 }
 0x5b6   : > { %v2177_v12 = vrot.slane %v2176_v36, 4 }
 0x5b7   : > { %v2183_v35 = vsel %vm1457_vm8, %v2153_v9, 0.0 }
 0x5b8   : > { %v2097_v47 = vpop.permute.xlu0 %2096  ;;  %v2178_v43 = vadd.f32 %v2177_v12, %v2176_v36  ;;  %v4000_v36 = vmax.f32 %v3524_v61, 0.0 }
 0x5b9   : > { %v2154_v25 = vmul.f32 %v2097_v47, %v3986_v37  ;;  %v2170_v37 = vrot.slane %v2169_v7, 2 }
 0x5ba   : > { %v2179_v47 = vrot.slane %v2178_v43, 2 }
 0x5bb   : > { %v2184_v60 = vsel %vm1457_vm8, %v2154_v25, 0.0  ;;  %v2171_v13 = vadd.f32 %v2170_v37, %v2169_v7 }
 0x5bc   : > { %v2102_v4 = vpop.permute.xlu0 %2101  ;;  %v2185_v29 = vadd.f32 %v2184_v60, %v2183_v35  ;;  %v2180_v21 = vadd.f32 %v2179_v47, %v2178_v43 }
 0x5bd   : > { %v2155_v46 = vmul.f32 %v2102_v4, %v3991_v11  ;;  %v2172_v35 = vrot.slane %v2171_v13, 1 }
 0x5be   : > { %v2186_v26 = vrot.slane %v2185_v29, 4  ;;  %v2181_v18 = vrot.slane %v2180_v21, 1 }
 0x5bf   : > { %v2192_v42 = vsel %vm1457_vm8, %v2155_v46, 0.0  ;;  %v3999_v46 = vmax.f32 %v3527_v59, 0.0 }
 0x5c0   : > { %v2107_v3 = vpop.permute.xlu0 %2106  ;;  %v2187_v14 = vadd.f32 %v2186_v26, %v2185_v29 }
 0x5c1   : > { %v2156_v20 = vmul.f32 %v2107_v3, %v3992_v10  ;;  %v3998_v3 = vmax.f32 %v3530_v63, 0.0  ;;  %v2163_v10 = vmul.f32 %v2142_v17, %v3999_v46 }
 0x5c2   : > { %v2188_v31 = vrot.slane %v2187_v14, 2 }
 0x5c3   : > { %v2193_v15 = vsel %vm1457_vm8, %v2156_v20, 0.0  ;;  %v2228_v29 = vsel %vm1457_vm8, %v2163_v10, 0.0 }
 0x5c4   : > { %v2112_v30 = vpop.permute.xlu0 %2111  ;;  %v2194_v32 = vadd.f32 %v2193_v15, %v2192_v42  ;;  %v2189_v9 = vadd.f32 %v2188_v31, %v2187_v14 }
 0x5c5   : > { %v2157_v5 = vmul.f32 %v2112_v30, %v3994_v33  ;;  %v2182_v33 = vadd.f32 %v2181_v18, %v2180_v21 }
 0x5c6   : > { %v2195_v38 = vrot.slane %v2194_v32, 4  ;;  %v2190_v15 = vrot.slane %v2189_v9, 1 }
 0x5c7   : > { %v2201_v53 = vsel %vm1457_vm8, %v2157_v5, 0.0  ;;  %v2238_v61 = vpack.c.bf16 %v2182_v33, %v2182_v33 }
 0x5c8   : > { %v2203_v45 = vadd.f32 %v2202_v2, %v2201_v53  ;;  %v2122_v62 = vpop.permute.xlu0 %2121  ;;  %v2196_v0 = vadd.f32 %v2195_v38, %v2194_v32  ;;  %v2191_v2 = vadd.f32 %v2190_v15, %v2189_v9  ;;  %v2173_v53 = vadd.f32 %v2172_v35, %v2171_v13  ;;  %v2611_v13 = vld [vmem:[%s3961_s7] ss:$0 sm:$0xff] }
 0x5c9   : > { %v2159_v50 = vmul.f32 %v2122_v62, %v3995_v57 }
 0x5ca   : > { %v2204_v39 = vrot.slane %v2203_v45, 4  ;;  %v2197_v55 = vrot.slane %v2196_v0, 2  ;;  %v2239_v57 = vpack.c.bf16 %v2191_v2, %v2191_v2 }
 0x5cb   : > { %v2210_v48 = vsel %vm1457_vm8, %v2159_v50, 0.0  ;;  %v2237_v50 = vpack.c.bf16 %v2173_v53, %v2173_v53 }
 0x5cc   : > { %v2127_v8 = vpop.permute.xlu0 %2126  ;;  %v2205_v27 = vadd.f32 %v2204_v39, %v2203_v45  ;;  %v2198_v16 = vadd.f32 %v2197_v55, %v2196_v0 }
 0x5cd   : > { %v2160_v23 = vmul.f32 %v2127_v8, %v3996_v1 }
 0x5ce   : > { %v2206_v24 = vrot.slane %v2205_v27, 2  ;;  %v2199_v30 = vrot.slane %v2198_v16, 1 }
 0x5cf   : > { %v2211_v28 = vsel %vm1457_vm8, %v2160_v23, 0.0  ;;  %v2263_v23 = vunpack.c.l.b16 %v2238_v61 }
 0x5d0   : > { %v2212_v4 = vadd.f32 %v2211_v28, %v2210_v48  ;;  %v2132_v52 = vpop.permute.xlu0 %2131  ;;  %v2207_v20 = vadd.f32 %v2206_v24, %v2205_v27  ;;  %v2200_v12 = vadd.f32 %v2199_v30, %v2198_v16  ;;  %v2264_v48 = vunpack.c.l.b16 %v2239_v57 }
 0x5d1   : > { %v2161_v51 = vmul.f32 %v2132_v52, %v3997_v49  ;;  %v2262_v28 = vunpack.c.l.b16 %v2237_v50 }
 0x5d2   : > { %v2213_v25 = vrot.slane %v2212_v4, 4  ;;  %v2208_v59 = vrot.slane %v2207_v20, 1  ;;  %v2240_v43 = vpack.c.bf16 %v2200_v12, %v2200_v12 }
 0x5d3   : > { %v2219_v60 = vsel %vm1457_vm8, %v2161_v51, 0.0  ;;  %v2270_v37 = vsel %vm1757_vm11, %v2263_v23, %v2262_v28 }
 0x5d4   : > { %v2214_v22 = vadd.f32 %v2213_v25, %v2212_v4  ;;  %v2137_v56 = vpop.permute.xlu0 %2136  ;;  %v2209_v26 = vadd.f32 %v2208_v59, %v2207_v20  ;;  %v2265_v47 = vunpack.c.l.b16 %v2240_v43  ;;  %v2271_v24 = vsel %vm1759_vm12, %v2264_v48, %v2270_v37 }
 0x5d5   : > { %v2162_v34 = vmul.f32 %v2137_v56, %v3998_v3 }
 0x5d6   : > { %v2215_v11 = vrot.slane %v2214_v22, 2  ;;  %v2241_v1 = vpack.c.bf16 %v2209_v26, %v2209_v26  ;;  %v2272_v51 = vsel %vm1761_vm13, %v2265_v47, %v2271_v24 }
 0x5d7   : > { %v2220_v54 = vsel %vm1457_vm8, %v2162_v34, 0.0 }
 0x5d8   : > { %v2216_v6 = vadd.f32 %v2215_v11, %v2214_v22  ;;  %v2221_v41 = vadd.f32 %v2220_v54, %v2219_v60  ;;  %v2147_v19 = vpop.permute.xlu0 %2146  ;;  %v2266_v31 = vunpack.c.l.b16 %v2241_v1 }
 0x5d9   : > { %v2164_v63 = vmul.f32 %v2147_v19, %v4000_v36 }
 0x5da   : > { %v2222_v44 = vrot.slane %v2221_v41, 4  ;;  %v2217_v5 = vrot.slane %v2216_v6, 1  ;;  %v2273_v21 = vsel %vm1763_vm14, %v2266_v31, %v2272_v51 }
 0x5db   : > { %v2229_v42 = vsel %vm1457_vm8, %v2164_v63, 0.0 }
 0x5dc   : > { %v2223_v58 = vadd.f32 %v2222_v44, %v2221_v41  ;;  %v2230_v32 = vadd.f32 %v2229_v42, %v2228_v29  ;;  %v2218_v40 = vadd.f32 %v2217_v5, %v2216_v6 }
 0x5de   : > { %v2224_v45 = vrot.slane %v2223_v58, 2  ;;  %v2231_v62 = vrot.slane %v2230_v32, 4  ;;  %v2242_v7 = vpack.c.bf16 %v2218_v40, %v2218_v40 }
 0x5e0   : > { %v2225_v38 = vadd.f32 %v2224_v45, %v2223_v58  ;;  %v2232_v39 = vadd.f32 %v2231_v62, %v2230_v32  ;;  %v2267_v55 = vunpack.c.l.b16 %v2242_v7 }
 0x5e2   : > { %v2226_v8 = vrot.slane %v2225_v38, 1  ;;  %v2233_v14 = vrot.slane %v2232_v39, 2  ;;  %v2274_v22 = vsel %vm1765_vm15, %v2267_v55, %v2273_v21 }
 0x5e4   : > { %v2227_v0 = vadd.f32 %v2226_v8, %v2225_v38  ;;  %v2234_v27 = vadd.f32 %v2233_v14, %v2232_v39 }
 0x5e6   : > { %v2243_v4 = vpack.c.bf16 %v2227_v0, %v2227_v0  ;;  %v2235_v52 = vrot.slane %v2234_v27, 1 }
 0x5e8   : > { %v2236_v25 = vadd.f32 %v2235_v52, %v2234_v27  ;;  %v2268_v49 = vunpack.c.l.b16 %v2243_v4 }
 0x5ea   : > { %v2244_v17 = vpack.c.bf16 %v2236_v25, %v2236_v25  ;;  %v2275_v9 = vsel %vm1767_vm0, %v2268_v49, %v2274_v22 }
 0x5ec   : > { %v2269_v56 = vunpack.c.l.b16 %v2244_v17 }
 0x5ee   : > { %v2276_v3 = vsel %vm1769_vm1, %v2269_v56, %v2275_v9 }
 0x5ef   : > { %v2277_v34 = vpack.c.b16 %v2276_v3, %v2276_v3 }
 0x5f1   : > { %2795 = vmatmul.mubr.msk.bf16.vlgmr.msra.gmra.mxu0 %vm1457_vm8, %v2277_v34 }
 0x6b1   : > { %v2321_v16 = vpop.f32.mrf.mxu0 }
 0x6b2   : > { %v2322_v11 = vadd.f32 %v2611_v13, %v2321_v16 }
 0x6b3   : > { %v2796_v46 = vpop.f32.mrf.mxu0 }
 0x6b4   : > { %v2327_v10 = vmax.f32 %v2322_v11, 0.0 }
 0x6b5   : > { %v2324_v20 = vpop.f32.mrf.mxu0 }
 0x6b6   : > { %2328 = vst [vmem:[%s527_s18] sm:$0xff] %v2327_v10 }
 0x6b7   : > { %v2797_v60 = vpop.f32.mrf.mxu0 }
 0x6b8   : > { %2950 = shalt.err (!%p2947_p5)
}
 0x6b9   : > { %s2951_s10 = scalar_lea.hbm %s3911_s22, 128  ;;  %s2955_s13 = scalar_lea.hbm %s3962_s8, 256 }
 0x6ba   : > { %p2952_p7 = scmp.ne.s32.totalorder %s3911_s22, %s2951_s10  ;;  %p2956_p12 = scmp.lt.s32.totalorder %s3911_s22, %s3962_s8 }
 0x6bb   : > { %p2957_p13 = scmp.lt.s32.totalorder %s2955_s13, %s2951_s10 }
 0x6bc   : > { %p2953_p10 = pnand %p2952_p7, %p3087_p6 }
 0x6bd   : > { %p2958_p0 = por %p2957_p13, %p2956_p12 }
 0x6be   : > { %p2954_p11 = pneg %p2953_p10 }
 0x6c0   : > { %p2959_p1 = pnand %p2958_p0, %p2954_p11 }
 0x6c2   : > { %2962 = shalt.err (!%p2959_p1)
}
 0x6c3   : > { %2800 = dma.vmem_to_hbm [thread:$0]  (%p3087_p6), %s3913_s19, 128, %s3911_s22, %s2330_s23  }
 0x6c4 PF: > { %s2355_s21 = sand.u32 1, %s2985_s27   ;;  %p2803_p2 = pnand %p2410_p9, %p3091_p8 }
 0x6c5   : > { %s2356_s9 = scalar_lea.sflag [#allocation4], %s2355_s21 }
 0x6c6   : > { %p2804_p3 = pneg %p2803_p2 }
 0x6c8   : > { %2980 = dma.done.wait (%p2804_p3), %s2356_s9, 128  }
 0x6c9   : > { %2982 = vsyncadd (%p2804_p3), %s2356_s9, 4294967168  ;;  %p18_p4 = scmp.ge.s32.totalorder %s3072_s11, 4   ;;  %s4001_s27 = smov %s2989_s28 }
 0x6ca   : > { %s4002_s28 = smov %s2993_s29  ;;  %s4003_s29 = smov %s3085_s14 }
 0x6cb   : > { %s4004_s30 = smov %s3072_s11  ;;  %20 = sbr.rel (!%p18_p4) target bundleno = 3 (0x3), region = 134 }
 0x6d0   :  { %2361 = vsyncpa [#allocation4], 1 }
 0x6d1   :  { %2363 = vsyncpa [#allocation4 + $0x1], 1 }

</bundles_post_ra>
